<compile_context>
chip_gen: v5e
topology: v5e:2x2
jax: 0.10.0
libtpu: 0.0.40
codegen_flags: <defaults>
</compile_context>

<pallas_src>
import functools

import jax
import jax.numpy as jnp
from jax.experimental import pallas as pl
from jax.experimental.pallas import tpu as pltpu


_LANE = 128   # lane width
_SUB = 8      # f32 sublane granularity


def _round_up(x, m):
    return ((x + m - 1) // m) * m


# -----------------------------------------------------------------------------
# Fused (conv3x3 + BN + ReLU) * 2 kernel
# -----------------------------------------------------------------------------
def _fused_double_conv_kernel(xf_ref, w1_ref, sh1_ref, w2_ref, sh2_ref,
                              mask_ref, o_ref, *, wp, ts, l_in):
    # xf_ref  : (Cin_pad , L_in)       flattened zero-padded input plane
    # w1_ref  : (C1_pad  , 9*Cin_pad)  layer-1 weights, taps folded, BN scale folded
    # sh1_ref : (C1_pad  , 1)          layer-1 BN shift
    # w2_ref  : (C2_pad  , 9*C1_pad)   layer-2 weights
    # sh2_ref : (C2_pad  , 1)          layer-2 BN shift
    # mask_ref: (1, ts)                1.0 on valid flattened outputs, 0.0 on
    #                                  row-wrap columns and lane-pad tail
    # o_ref   : (C2_pad  , ts)         lane-dense output slab
    taps = tuple(dy * wp + dx for dy in range(3) for dx in range(3))

    def conv3x3_bn_relu(x_full, w9, shift):
        # x_full: (C, l_in) flattened padded plane.  Build the 9 tap operands
        # with XLU rolls (lane-aligned slices afterwards), stack them on the
        # sublane axis, and do a single K = 9*C MXU contraction.
        slabs = []
        for off in taps:
            if off == 0:
                shifted = x_full
            else:
                shifted = pltpu.roll(x_full, shift=l_in - off, axis=1)
            slabs.append(shifted[:, :ts])          # lane-aligned static slice
        x9 = jnp.concatenate(slabs, axis=0)        # (9*C, ts)
        y = jnp.dot(w9, x9, preferred_element_type=jnp.float32,
                    precision=jax.lax.Precision.HIGHEST)
        return jnp.maximum(y + shift, 0.0)         # fused BN shift + ReLU

    # ---- layer 1 -------------------------------------------------------------
    x0 = xf_ref[...].astype(jnp.float32)                       # (Cin_pad, l_in)
    y1 = conv3x3_bn_relu(x0, w1_ref[...], sh1_ref[...])        # (C1_pad, ts)

    # Zero the row-wrap columns / lane-pad tail, then shift the valid pixels
    # into padded-plane coordinates (flat offset +Wp+1).  The circular wrap of
    # the roll only brings zeros (from the zero tail) to the halo positions.
    y1 = y1 * mask_ref[...]
    mid = jnp.concatenate(
        [y1, jnp.zeros((y1.shape[0], l_in - ts), jnp.float32)], axis=-1)
    mid = pltpu.roll(mid, shift=wp + 1, axis=1)                # (C1_pad, l_in)

    # ---- layer 2 (reads the intermediate straight from vregs/VMEM) ----------
    y2 = conv3x3_bn_relu(mid, w2_ref[...], sh2_ref[...])       # (C2_pad, ts)
    o_ref[...] = y2.astype(o_ref.dtype)


def _fold_bn_and_taps(weight, gamma, beta, mean, var, cin_pad, cout_pad,
                      eps=1e-5):
    """Fold eval-mode BatchNorm into the conv and reshape to (Cout_pad, 9*Cin_pad)."""
    cout, cin = weight.shape[0], weight.shape[1]
    scale = gamma / jnp.sqrt(var + eps)                           # (Cout,)
    shift = (beta - mean * scale).astype(jnp.float32)             # (Cout,)
    wf = weight.astype(jnp.float32) * scale[:, None, None, None]  # (Cout,Cin,3,3)
    wpad = jnp.zeros((cout_pad, cin_pad, 3, 3), jnp.float32)
    wpad = wpad.at[:cout, :cin].set(wf)
    # (Cout_pad, Cin_pad, 3, 3) -> (Cout_pad, 3, 3, Cin_pad) -> (Cout_pad, 9*Cin_pad)
    # Row index inside K is tap*Cin_pad + ci, matching the in-kernel stacking.
    w9 = jnp.transpose(wpad, (0, 2, 3, 1)).reshape(cout_pad, 9 * cin_pad)
    sh = jnp.zeros((cout_pad, 1), jnp.float32).at[:cout, 0].set(shift)
    return w9, sh


def _double_conv_fused(x, p, eps=1e-5):
    """ReLU(BN(conv3x3(ReLU(BN(conv3x3(x)))))), both layers in one Pallas kernel."""
    n, cin, h, w = x.shape
    cout = p['w1'].shape[0]
    hp, wpp = h + 2, w + 2
    lout = h * wpp                                    # valid flattened outputs
    ts = _round_up(lout, _LANE)                       # compute length (lanes)
    l_in = _round_up(ts + 2 * wpp + 2, _LANE)         # input plane length (lanes)
    cin_pad = _round_up(cin, _SUB)
    cout_pad = _round_up(cout, _SUB)

    w9_1, sh1 = _fold_bn_and_taps(p['w1'], p['g1'], p['b1'], p['m1'], p['v1'],
                                  cin_pad, cout_pad, eps)
    w9_2, sh2 = _fold_bn_and_taps(p['w2'], p['g2'], p['b2'], p['m2'], p['v2'],
                                  cout_pad, cout_pad, eps)

    # Zero-pad spatially, flatten (H+2)*(W+2) onto the lane axis, pad channels
    # to a sublane multiple and lanes to l_in.
    xpad = jnp.pad(x, ((0, 0), (0, 0), (1, 1), (1, 1)))
    xf = xpad.reshape(n, cin, hp * wpp)
    xf = jnp.pad(xf, ((0, 0), (0, cin_pad - cin), (0, l_in - hp * wpp)))

    # Valid-output mask: zero the 2 row-wrap columns of every flattened row and
    # the lane-pad tail (needed before layer 2 consumes the intermediate).
    pidx = jnp.arange(ts)
    mask = (((pidx % wpp) < w) & (pidx < lout)).astype(jnp.float32).reshape(1, ts)

    kernel = functools.partial(_fused_double_conv_kernel,
                               wp=wpp, ts=ts, l_in=l_in)

    out_flat = pl.pallas_call(
        kernel,
        out_shape=jax.ShapeDtypeStruct((n, cout_pad, ts), x.dtype),
        grid_spec=pltpu.PrefetchScalarGridSpec(
            num_scalar_prefetch=0,
            grid=(n,),
            in_specs=[
                pl.BlockSpec((None, cin_pad, l_in), lambda i: (i, 0, 0)),
                pl.BlockSpec((cout_pad, 9 * cin_pad), lambda i: (0, 0)),
                pl.BlockSpec((cout_pad, 1), lambda i: (0, 0)),
                pl.BlockSpec((cout_pad, 9 * cout_pad), lambda i: (0, 0)),
                pl.BlockSpec((cout_pad, 1), lambda i: (0, 0)),
                pl.BlockSpec((1, ts), lambda i: (0, 0)),
            ],
            out_specs=pl.BlockSpec((None, cout_pad, ts), lambda i: (i, 0, 0)),
        ),
        compiler_params=pltpu.CompilerParams(
            dimension_semantics=("parallel",),
            vmem_limit_bytes=48 * 1024 * 1024),
    )(xf, w9_1, sh1, w9_2, sh2, mask)

    # Un-flatten: rows have length W+2; keep the W valid columns of each row.
    return out_flat[:, :cout, :lout].reshape(n, cout, h, wpp)[:, :, :, :w]


# -----------------------------------------------------------------------------
# Upsample / pad / concat (cheap data movement, plain JAX)
# -----------------------------------------------------------------------------
def _interp_matrix_align_corners(n_in, n_out, dtype=jnp.float32):
    """(n_out, n_in) matrix matching Upsample(mode='bilinear', align_corners=True)."""
    if n_in == 1:
        return jnp.ones((n_out, 1), dtype)
    src = jnp.arange(n_out, dtype=jnp.float32) * ((n_in - 1) / (n_out - 1))
    lo = jnp.clip(jnp.floor(src).astype(jnp.int32), 0, n_in - 2)
    frac = src - lo.astype(jnp.float32)
    rows = jnp.arange(n_out)
    m = jnp.zeros((n_out, n_in), jnp.float32)
    m = m.at[rows, lo].add(1.0 - frac)
    m = m.at[rows, lo + 1].add(frac)
    return m.astype(dtype)


def _upsample2x_bilinear_align_corners(x):
    n, c, h, w = x.shape
    uh = _interp_matrix_align_corners(h, 2 * h, x.dtype)
    uw = _interp_matrix_align_corners(w, 2 * w, x.dtype)
    y = jnp.einsum('ph,nchw->ncpw', uh, x)
    y = jnp.einsum('qw,ncpw->ncpq', uw, y)
    return y


def _merge_inputs(x1, x2):
    x1u = _upsample2x_bilinear_align_corners(x1)
    dy = x2.shape[2] - x1u.shape[2]
    dx = x2.shape[3] - x1u.shape[3]
    x1u = jnp.pad(x1u, ((0, 0), (0, 0),
                        (dy // 2, dy - dy // 2),
                        (dx // 2, dx - dx // 2)))
    return jnp.concatenate([x2, x1u], axis=1)


def up_forward(x1, x2, p):
    """Forward of `up` (bilinear=True, norm=True); BatchNorm in eval mode."""
    x = _merge_inputs(x1, x2)
    return _double_conv_fused(x, p)


# -----------------------------------------------------------------------------
# Pure-JAX reference for correctness checking
# -----------------------------------------------------------------------------
def _ref_conv_bn_relu(x, w, gamma, beta, mean, var, eps=1e-5):
    y = jax.lax.conv_general_dilated(
        x, w, window_strides=(1, 1), padding=((1, 1), (1, 1)),
        dimension_numbers=('NCHW', 'OIHW', 'NCHW'))
    inv = 1.0 / jnp.sqrt(var + eps)
    y = (y - mean[None, :, None, None]) * (gamma * inv)[None, :, None, None] \
        + beta[None, :, None, None]
    return jnp.maximum(y, 0.0)


def up_forward_ref(x1, x2, p):
    x = _merge_inputs(x1, x2)
    x = _ref_conv_bn_relu(x, p['w1'], p['g1'], p['b1'], p['m1'], p['v1'])
    x = _ref_conv_bn_relu(x, p['w2'], p['g2'], p['b2'], p['m2'], p['v2'])
    return x


if __name__ == "__main__":
    key = jax.random.PRNGKey(0)
    ks = jax.random.split(key, 12)

    # up(in_ch=8, out_ch=4, bilinear=True, norm=True)
    in_ch, out_ch = 8, 4
    N, H, W = 2, 16, 16
    c1 = in_ch // 2                 # deep feature map (to be upsampled)
    c2 = in_ch - c1                 # skip connection

    x1 = jax.random.normal(ks[0], (N, c1, H // 2, W // 2), jnp.float32)
    x2 = jax.random.normal(ks[1], (N, c2, H, W), jnp.float32)

    params = dict(
        w1=jax.random.normal(ks[2], (out_ch, in_ch, 3, 3), jnp.float32) * 0.2,
        g1=1.0 + 0.1 * jax.random.normal(ks[3], (out_ch,), jnp.float32),
        b1=0.1 * jax.random.normal(ks[4], (out_ch,), jnp.float32),
        m1=0.1 * jax.random.normal(ks[5], (out_ch,), jnp.float32),
        v1=1.0 + 0.1 * jax.random.uniform(ks[6], (out_ch,), jnp.float32),
        w2=jax.random.normal(ks[7], (out_ch, out_ch, 3, 3), jnp.float32) * 0.2,
        g2=1.0 + 0.1 * jax.random.normal(ks[8], (out_ch,), jnp.float32),
        b2=0.1 * jax.random.normal(ks[9], (out_ch,), jnp.float32),
        m2=0.1 * jax.random.normal(ks[10], (out_ch,), jnp.float32),
        v2=1.0 + 0.1 * jax.random.uniform(ks[11], (out_ch,), jnp.float32),
    )

    out = jax.block_until_ready(jax.jit(up_forward)(x1, x2, params))
    ref = jax.block_until_ready(jax.jit(up_forward_ref)(x1, x2, params))

    assert out.shape == (N, out_ch, H, W), out.shape
    assert jnp.allclose(out, ref, atol=2e-3, rtol=2e-3), float(
        jnp.max(jnp.abs(out - ref)))
    print("KERNEL_OK")
</pallas_src>

<mosaic_0001>
module attributes {stable_mosaic.version = 11 : i64} {
  func.func @_fused_double_conv_kernel(%arg0: i32, %arg1: memref<1x8x512xf32, #tpu.memory_space<vmem>>, %arg2: memref<8x72xf32, #tpu.memory_space<vmem>>, %arg3: memref<8x1xf32, #tpu.memory_space<vmem>>, %arg4: memref<8x72xf32, #tpu.memory_space<vmem>>, %arg5: memref<8x1xf32, #tpu.memory_space<vmem>>, %arg6: memref<1x384xf32, #tpu.memory_space<vmem>>, %arg7: memref<1x8x384xf32, #tpu.memory_space<vmem>>) attributes {dimension_semantics = [#tpu.dimension_semantics<parallel>], iteration_bounds = array<i64: 2>, scalar_prefetch = 0 : i64, scratch_operands = 0 : i64, tpu.core_type = #tpu.core_type<tc>, window_params = [{transform_indices = @transform_0, window_bounds = array<i64: 1, 8, 512>}, {pipeline_mode = #tpu.pipeline_mode<synchronous>, transform_indices = @transform_1, window_bounds = array<i64: 8, 72>}, {pipeline_mode = #tpu.pipeline_mode<synchronous>, transform_indices = @transform_2, window_bounds = array<i64: 8, 1>}, {pipeline_mode = #tpu.pipeline_mode<synchronous>, transform_indices = @transform_3, window_bounds = array<i64: 8, 72>}, {pipeline_mode = #tpu.pipeline_mode<synchronous>, transform_indices = @transform_4, window_bounds = array<i64: 8, 1>}, {pipeline_mode = #tpu.pipeline_mode<synchronous>, transform_indices = @transform_5, window_bounds = array<i64: 1, 384>}, {transform_indices = @transform_6, window_bounds = array<i64: 1, 8, 384>}]} {
    %c0 = arith.constant 0 : index
    %c0_0 = arith.constant 0 : index
    %c0_1 = arith.constant 0 : index
    %0 = vector.load %arg1[%c0, %c0_0, %c0_1] : memref<1x8x512xf32, #tpu.memory_space<vmem>>, vector<1x8x512xf32>
    %1 = vector.shape_cast %0 : vector<1x8x512xf32> to vector<8x512xf32>
    %c0_2 = arith.constant 0 : index
    %c0_3 = arith.constant 0 : index
    %2 = vector.load %arg2[%c0_2, %c0_3] : memref<8x72xf32, #tpu.memory_space<vmem>>, vector<8x72xf32>
    %c0_4 = arith.constant 0 : index
    %c0_5 = arith.constant 0 : index
    %3 = vector.load %arg3[%c0_4, %c0_5] : memref<8x1xf32, #tpu.memory_space<vmem>>, vector<8x1xf32>
    %4 = vector.extract_strided_slice %1 {offsets = [0, 0], sizes = [8, 384], strides = [1, 1]} : vector<8x512xf32> to vector<8x384xf32>
    %c511_i32 = arith.constant 511 : i32
    %5 = tpu.dynamic_rotate %1 by %c511_i32 dim 1 : vector<8x512xf32>, i32 -> vector<8x512xf32>
    %6 = vector.extract_strided_slice %5 {offsets = [0, 0], sizes = [8, 384], strides = [1, 1]} : vector<8x512xf32> to vector<8x384xf32>
    %c510_i32 = arith.constant 510 : i32
    %7 = tpu.dynamic_rotate %1 by %c510_i32 dim 1 : vector<8x512xf32>, i32 -> vector<8x512xf32>
    %8 = vector.extract_strided_slice %7 {offsets = [0, 0], sizes = [8, 384], strides = [1, 1]} : vector<8x512xf32> to vector<8x384xf32>
    %c494_i32 = arith.constant 494 : i32
    %9 = tpu.dynamic_rotate %1 by %c494_i32 dim 1 : vector<8x512xf32>, i32 -> vector<8x512xf32>
    %10 = vector.extract_strided_slice %9 {offsets = [0, 0], sizes = [8, 384], strides = [1, 1]} : vector<8x512xf32> to vector<8x384xf32>
    %c493_i32 = arith.constant 493 : i32
    %11 = tpu.dynamic_rotate %1 by %c493_i32 dim 1 : vector<8x512xf32>, i32 -> vector<8x512xf32>
    %12 = vector.extract_strided_slice %11 {offsets = [0, 0], sizes = [8, 384], strides = [1, 1]} : vector<8x512xf32> to vector<8x384xf32>
    %c492_i32 = arith.constant 492 : i32
    %13 = tpu.dynamic_rotate %1 by %c492_i32 dim 1 : vector<8x512xf32>, i32 -> vector<8x512xf32>
    %14 = vector.extract_strided_slice %13 {offsets = [0, 0], sizes = [8, 384], strides = [1, 1]} : vector<8x512xf32> to vector<8x384xf32>
    %c476_i32 = arith.constant 476 : i32
    %15 = tpu.dynamic_rotate %1 by %c476_i32 dim 1 : vector<8x512xf32>, i32 -> vector<8x512xf32>
    %16 = vector.extract_strided_slice %15 {offsets = [0, 0], sizes = [8, 384], strides = [1, 1]} : vector<8x512xf32> to vector<8x384xf32>
    %c475_i32 = arith.constant 475 : i32
    %17 = tpu.dynamic_rotate %1 by %c475_i32 dim 1 : vector<8x512xf32>, i32 -> vector<8x512xf32>
    %18 = vector.extract_strided_slice %17 {offsets = [0, 0], sizes = [8, 384], strides = [1, 1]} : vector<8x512xf32> to vector<8x384xf32>
    %c474_i32 = arith.constant 474 : i32
    %19 = tpu.dynamic_rotate %1 by %c474_i32 dim 1 : vector<8x512xf32>, i32 -> vector<8x512xf32>
    %20 = vector.extract_strided_slice %19 {offsets = [0, 0], sizes = [8, 384], strides = [1, 1]} : vector<8x512xf32> to vector<8x384xf32>
    %21 = tpu.concatenate %4, %6, %8, %10, %12, %14, %16, %18, %20 in 0 : vector<8x384xf32>, vector<8x384xf32>, vector<8x384xf32>, vector<8x384xf32>, vector<8x384xf32>, vector<8x384xf32>, vector<8x384xf32>, vector<8x384xf32>, vector<8x384xf32> -> vector<72x384xf32>
    %cst = arith.constant dense<0.000000e+00> : vector<8x384xf32>
    %22 = tpu.matmul %2, %21, %cst {dimension_numbers = #tpu.dot_dimension_numbers<[1], [0], [0], [1], [0, 0, 1, 1], [], []>, precision = #tpu.contract_precision<fp32>} : vector<8x72xf32>, vector<72x384xf32>, vector<8x384xf32> -> vector<8x384xf32>
    %23 = vector.broadcast %3 : vector<8x1xf32> to vector<8x384xf32>
    %24 = arith.addf %22, %23 : vector<8x384xf32>
    %cst_6 = arith.constant 0.000000e+00 : f32
    %25 = vector.broadcast %cst_6 : f32 to vector<8x384xf32>
    %26 = arith.maximumf %24, %25 : vector<8x384xf32>
    %c0_7 = arith.constant 0 : index
    %c0_8 = arith.constant 0 : index
    %27 = vector.load %arg6[%c0_7, %c0_8] : memref<1x384xf32, #tpu.memory_space<vmem>>, vector<1x384xf32>
    %28 = vector.broadcast %27 : vector<1x384xf32> to vector<8x384xf32>
    %29 = arith.mulf %26, %28 : vector<8x384xf32>
    %cst_9 = arith.constant 0.000000e+00 : f32
    %30 = vector.broadcast %cst_9 : f32 to vector<8x128xf32>
    %31 = tpu.concatenate %29, %30 in 1 : vector<8x384xf32>, vector<8x128xf32> -> vector<8x512xf32>
    %c19_i32 = arith.constant 19 : i32
    %32 = tpu.dynamic_rotate %31 by %c19_i32 dim 1 : vector<8x512xf32>, i32 -> vector<8x512xf32>
    %c0_10 = arith.constant 0 : index
    %c0_11 = arith.constant 0 : index
    %33 = vector.load %arg4[%c0_10, %c0_11] : memref<8x72xf32, #tpu.memory_space<vmem>>, vector<8x72xf32>
    %c0_12 = arith.constant 0 : index
    %c0_13 = arith.constant 0 : index
    %34 = vector.load %arg5[%c0_12, %c0_13] : memref<8x1xf32, #tpu.memory_space<vmem>>, vector<8x1xf32>
    %35 = vector.extract_strided_slice %32 {offsets = [0, 0], sizes = [8, 384], strides = [1, 1]} : vector<8x512xf32> to vector<8x384xf32>
    %c511_i32_14 = arith.constant 511 : i32
    %36 = tpu.dynamic_rotate %32 by %c511_i32_14 dim 1 : vector<8x512xf32>, i32 -> vector<8x512xf32>
    %37 = vector.extract_strided_slice %36 {offsets = [0, 0], sizes = [8, 384], strides = [1, 1]} : vector<8x512xf32> to vector<8x384xf32>
    %c510_i32_15 = arith.constant 510 : i32
    %38 = tpu.dynamic_rotate %32 by %c510_i32_15 dim 1 : vector<8x512xf32>, i32 -> vector<8x512xf32>
    %39 = vector.extract_strided_slice %38 {offsets = [0, 0], sizes = [8, 384], strides = [1, 1]} : vector<8x512xf32> to vector<8x384xf32>
    %c494_i32_16 = arith.constant 494 : i32
    %40 = tpu.dynamic_rotate %32 by %c494_i32_16 dim 1 : vector<8x512xf32>, i32 -> vector<8x512xf32>
    %41 = vector.extract_strided_slice %40 {offsets = [0, 0], sizes = [8, 384], strides = [1, 1]} : vector<8x512xf32> to vector<8x384xf32>
    %c493_i32_17 = arith.constant 493 : i32
    %42 = tpu.dynamic_rotate %32 by %c493_i32_17 dim 1 : vector<8x512xf32>, i32 -> vector<8x512xf32>
    %43 = vector.extract_strided_slice %42 {offsets = [0, 0], sizes = [8, 384], strides = [1, 1]} : vector<8x512xf32> to vector<8x384xf32>
    %c492_i32_18 = arith.constant 492 : i32
    %44 = tpu.dynamic_rotate %32 by %c492_i32_18 dim 1 : vector<8x512xf32>, i32 -> vector<8x512xf32>
    %45 = vector.extract_strided_slice %44 {offsets = [0, 0], sizes = [8, 384], strides = [1, 1]} : vector<8x512xf32> to vector<8x384xf32>
    %c476_i32_19 = arith.constant 476 : i32
    %46 = tpu.dynamic_rotate %32 by %c476_i32_19 dim 1 : vector<8x512xf32>, i32 -> vector<8x512xf32>
    %47 = vector.extract_strided_slice %46 {offsets = [0, 0], sizes = [8, 384], strides = [1, 1]} : vector<8x512xf32> to vector<8x384xf32>
    %c475_i32_20 = arith.constant 475 : i32
    %48 = tpu.dynamic_rotate %32 by %c475_i32_20 dim 1 : vector<8x512xf32>, i32 -> vector<8x512xf32>
    %49 = vector.extract_strided_slice %48 {offsets = [0, 0], sizes = [8, 384], strides = [1, 1]} : vector<8x512xf32> to vector<8x384xf32>
    %c474_i32_21 = arith.constant 474 : i32
    %50 = tpu.dynamic_rotate %32 by %c474_i32_21 dim 1 : vector<8x512xf32>, i32 -> vector<8x512xf32>
    %51 = vector.extract_strided_slice %50 {offsets = [0, 0], sizes = [8, 384], strides = [1, 1]} : vector<8x512xf32> to vector<8x384xf32>
    %52 = tpu.concatenate %35, %37, %39, %41, %43, %45, %47, %49, %51 in 0 : vector<8x384xf32>, vector<8x384xf32>, vector<8x384xf32>, vector<8x384xf32>, vector<8x384xf32>, vector<8x384xf32>, vector<8x384xf32>, vector<8x384xf32>, vector<8x384xf32> -> vector<72x384xf32>
    %cst_22 = arith.constant dense<0.000000e+00> : vector<8x384xf32>
    %53 = tpu.matmul %33, %52, %cst_22 {dimension_numbers = #tpu.dot_dimension_numbers<[1], [0], [0], [1], [0, 0, 1, 1], [], []>, precision = #tpu.contract_precision<fp32>} : vector<8x72xf32>, vector<72x384xf32>, vector<8x384xf32> -> vector<8x384xf32>
    %54 = vector.broadcast %34 : vector<8x1xf32> to vector<8x384xf32>
    %55 = arith.addf %53, %54 : vector<8x384xf32>
    %cst_23 = arith.constant 0.000000e+00 : f32
    %56 = vector.broadcast %cst_23 : f32 to vector<8x384xf32>
    %57 = arith.maximumf %55, %56 : vector<8x384xf32>
    %c0_24 = arith.constant 0 : index
    %c0_25 = arith.constant 0 : index
    %c0_26 = arith.constant 0 : index
    %58 = vector.load %arg7[%c0_24, %c0_25, %c0_26] : memref<1x8x384xf32, #tpu.memory_space<vmem>>, vector<1x8x384xf32>
    %59 = vector.shape_cast %58 : vector<1x8x384xf32> to vector<8x384xf32>
    %60 = vector.shape_cast %57 : vector<8x384xf32> to vector<1x8x384xf32>
    tpu.vector_store %arg7[%c0_24, %c0_25, %c0_26], %60 {strides = array<i32>} : memref<1x8x384xf32, #tpu.memory_space<vmem>>, vector<1x8x384xf32>,
    return
  }
  func.func @transform_0(%arg0: i32) -> (i32, i32, i32) {
    %c0_i32 = arith.constant 0 : i32
    %c0_i32_0 = arith.constant 0 : i32
    %c0_i32_1 = arith.constant 0 : i32
    return %arg0, %c0_i32, %c0_i32_0 : i32, i32, i32
  }
  func.func @transform_1(%arg0: i32) -> (i32, i32) {
    %c0_i32 = arith.constant 0 : i32
    %c0_i32_0 = arith.constant 0 : i32
    %c0_i32_1 = arith.constant 0 : i32
    return %c0_i32, %c0_i32_0 : i32, i32
  }
  func.func @transform_2(%arg0: i32) -> (i32, i32) {
    %c0_i32 = arith.constant 0 : i32
    %c0_i32_0 = arith.constant 0 : i32
    %c0_i32_1 = arith.constant 0 : i32
    return %c0_i32, %c0_i32_0 : i32, i32
  }
  func.func @transform_3(%arg0: i32) -> (i32, i32) {
    %c0_i32 = arith.constant 0 : i32
    %c0_i32_0 = arith.constant 0 : i32
    %c0_i32_1 = arith.constant 0 : i32
    return %c0_i32, %c0_i32_0 : i32, i32
  }
  func.func @transform_4(%arg0: i32) -> (i32, i32) {
    %c0_i32 = arith.constant 0 : i32
    %c0_i32_0 = arith.constant 0 : i32
    %c0_i32_1 = arith.constant 0 : i32
    return %c0_i32, %c0_i32_0 : i32, i32
  }
  func.func @transform_5(%arg0: i32) -> (i32, i32) {
    %c0_i32 = arith.constant 0 : i32
    %c0_i32_0 = arith.constant 0 : i32
    %c0_i32_1 = arith.constant 0 : i32
    return %c0_i32, %c0_i32_0 : i32, i32
  }
  func.func @transform_6(%arg0: i32) -> (i32, i32, i32) {
    %c0_i32 = arith.constant 0 : i32
    %c0_i32_0 = arith.constant 0 : i32
    %c0_i32_1 = arith.constant 0 : i32
    return %arg0, %c0_i32, %c0_i32_0 : i32, i32, i32
  }
}

</mosaic_0001>

<bundles_post_ra>
// kernel: up_forward.1
= control target key start
LH: loop header
LB: loop body
LE: loop exit
PB: predicated region body
PF: predicated region fallthrough
CT: control target
= control target key end

     0   :  { %s2138_s21 = smov 0   ;;  %s3360_s0 = inlined_call_operand.vmem [shape: f32[2,8,512], index: 0, kind: input, shape index: {}]   ;;  %s3361_s1 = inlined_call_operand.vmem [shape: f32[8,72], index: 1, kind: input, shape index: {}]   ;;  %s3362_s2 = inlined_call_operand.vmem [shape: f32[8,1], index: 2, kind: input, shape index: {}]   ;;  %s3363_s3 = inlined_call_operand.vmem [shape: f32[8,72], index: 3, kind: input, shape index: {}]   ;;  %s3364_s4 = inlined_call_operand.vmem [shape: f32[8,1], index: 4, kind: input, shape index: {}]   ;;  %s3365_s5 = inlined_call_operand.vmem [shape: f32[1,384], index: 5, kind: input, shape index: {}]   ;;  %s3366_s6 = inlined_call_operand.vmem [shape: f32[2,8,384], index: 6, kind: output, shape index: {}]  }
   0x1 LB: > { %s2051_s22 = sadd.s32 4294967295, %s2090_s21   ;;  %p2055_p0 = scmp.ge.s32.totalorder %s2090_s21, 1  ;;  %s2090_s21 = sphi %s2138_s21, %s16_s21  }
   0x2   : > { %p212_p1 = scmp.lt.s32.totalorder %s2090_s21, 3 }
   0x4   : > { %p213_p2 = pnand %p2055_p0, %p212_p1 }
   0x5   : > { %p242_p3 = scmp.lt.s32.totalorder (!%p213_p2), %s2051_s22, 1  ;;  %s2092_s27 = smov (!%p213_p2), 92  }
   0x6   : > { %216 = sbr.rel (%p213_p2) target bundleno = 848 (0x350), region = 44  ;;  %s2093_s28 = smov (!%p213_p2), 91  }
   0x7   : > { %s2094_s29 = smov (!%p213_p2), 90   ;;  %s2095_s30 = smov (!%p213_p2), 109  }
   0x8   : > { %s2096_s7 = smov (!%p213_p2), 108   ;;  %s2097_s8 = smov (!%p213_p2), 110  }
   0x9   : > { %s2098_s9 = smov (!%p213_p2), 126   ;;  %s2099_s10 = smov (!%p213_p2), 127  }
   0xa   : > { %s2102_s15 = smov (!%p213_p2), 19  }
   0xb   : > { %s3380_s22 = smov (!%p242_p3, %s2051_s22), 1  ;;  %v266_v6 = vlaneseq  ;;  %vm361_vm7 = vcmask 588800  }
   0xc   : > { %s2061_s23 = sshll.u32 %s3380_s22, 5  ;;  %s2062_s24 = smul.u32 24, %s3380_s22 }
   0xd   : > { %s2152_s26 = scalar_lea.vmem %s3360_s0, %s2061_s23  ;;  %v2222_v7 = vand.u32 127, %v266_v6 }
   0xe   : > { %v2155_v0 = vld [vmem:[%s2152_s26] sm:$0xff]  ;;  %v2164_v1 = vld [vmem:[%s2152_s26 + $0x8] sm:$0xff]  ;;  %v2179_v2 = vld [vmem:[%s2152_s26 + $0x10] sm:$0xff] }
   0xf   : > { %320 = vrot.lane.b32.xlu2 %v2155_v0, %s2092_s27  ;;  %332 = vrot.lane.b32.xlu1 %v2155_v0, %s2093_s28  ;;  %v255_v3 = vld [vmem:[%s2152_s26 + $0x18] sm:$0xff]  ;;  %vm328_vm0 = vcmp.lt.s32.totalorder %v2222_v7, 92  ;;  %vm340_vm1 = vcmp.lt.s32.totalorder %v2222_v7, 91  ;;  %vm352_vm2 = vcmp.lt.s32.totalorder %v2222_v7, 90  ;;  %vm316_vm3 = vcmp.lt.s32.totalorder %v2222_v7, 108 }
  0x10   : > { %344 = vrot.lane.b32.xlu0 %v2155_v0, %s2094_s29  ;;  %vm304_vm4 = vcmp.lt.s32.totalorder %v2222_v7, 109  ;;  %vm292_vm5 = vcmp.lt.s32.totalorder %v2222_v7, 110  ;;  %vm280_vm6 = vcmp.lt.s32.totalorder %v2222_v7, 126  ;;  %v2340_v61 = vand.u32 4294901760, %v2155_v0 }
  0x11   : > { %vm268_vm8 = vcmp.lt.s32.totalorder %v2222_v7, 127  ;;  %vm1137_vm9 = vcmp.lt.s32.totalorder %v2222_v7, 19 }
  0x17   : > { %322 = vrot.lane.b32.xlu2 %v2164_v1, %s2092_s27  ;;  %334 = vrot.lane.b32.xlu1 %v2164_v1, %s2093_s28 }
  0x18   : > { %346 = vrot.lane.b32.xlu0 %v2164_v1, %s2094_s29 }
  0x1f   : > { %296 = vrot.lane.b32.xlu2 %v2155_v0, %s2095_s30  ;;  %310 = vrot.lane.b32.xlu1 %v2164_v1, %s2096_s7 }
  0x20   : > { %308 = vrot.lane.b32.xlu0 %v2155_v0, %s2096_s7 }
  0x27   : > { %284 = vrot.lane.b32.xlu2 %v2155_v0, %s2097_s8  ;;  %348 = vrot.lane.b32.xlu1 %v2179_v2, %s2094_s29 }
  0x28   : > { %298 = vrot.lane.b32.xlu0 %v2164_v1, %s2095_s30 }
  0x2f   : > { %272 = vrot.lane.b32.xlu2 %v2155_v0, %s2098_s9  ;;  %336 = vrot.lane.b32.xlu1 %v2179_v2, %s2093_s28 }
  0x30   : > { %286 = vrot.lane.b32.xlu0 %v2164_v1, %s2097_s8 }
  0x37   : > { %258 = vrot.lane.b32.xlu2 %v2155_v0, %s2099_s10  ;;  %324 = vrot.lane.b32.xlu1 %v2179_v2, %s2092_s27 }
  0x38   : > { %274 = vrot.lane.b32.xlu0 %v2164_v1, %s2098_s9 }
  0x3f   : > { %300 = vrot.lane.b32.xlu2 %v2179_v2, %s2095_s30  ;;  %312 = vrot.lane.b32.xlu1 %v2179_v2, %s2096_s7 }
  0x40   : > { %260 = vrot.lane.b32.xlu0 %v2164_v1, %s2099_s10 }
  0x47   : > { %276 = vrot.lane.b32.xlu1 %v2179_v2, %s2098_s9  ;;  %262 = vrot.lane.b32.xlu2 %v2179_v2, %s2099_s10 }
  0x48   : > { %288 = vrot.lane.b32.xlu0 %v2179_v2, %s2097_s8 }
  0x4f   : > { %338 = vrot.lane.b32.xlu1 %v255_v3, %s2093_s28  ;;  %326 = vrot.lane.b32.xlu2 %v255_v3, %s2092_s27 }
  0x50   : > { %350 = vrot.lane.b32.xlu0 %v255_v3, %s2094_s29 }
  0x57   : > { %302 = vrot.lane.b32.xlu1 %v255_v3, %s2095_s30  ;;  %290 = vrot.lane.b32.xlu2 %v255_v3, %s2097_s8 }
  0x58   : > { %314 = vrot.lane.b32.xlu0 %v255_v3, %s2096_s7 }
  0x5f   : > { %264 = vrot.lane.b32.xlu1 %v255_v3, %s2099_s10 }
  0x60   : > { %278 = vrot.lane.b32.xlu0 %v255_v3, %s2098_s9 }
  0x69   : > { %v321_v4 = vpop.permute.xlu2 %320 }
  0x71   : > { %v2220_v5 = vpop.permute.xlu2 %322 }
  0x72   : > { %v331_v11 = vsel %vm328_vm0, %v321_v4, %v2220_v5 }
  0x73   : > { %v2229_v12 = vand.u32 4294901760, %v331_v11 }
  0x75   : > { %v2242_v19 = vsub.f32 %v331_v11, %v2229_v12 }
  0x77   : > { %v420_v25 = vand.u32 4294901760, %v2242_v19 }
  0x79   : > { %v297_v8 = vpop.permute.xlu2 %296  ;;  %v421_v34 = vsub.f32 %v2242_v19, %v420_v25 }
  0x7b   : > { %v422_v37 = vand.u32 4294901760, %v421_v34 }
  0x81   : > { %v333_v9 = vpop.permute.xlu1 %332  ;;  %v285_v14 = vpop.permute.xlu2 %284 }
  0x82   : > { %v345_v10 = vpop.permute.xlu0 %344 }
  0x89   : > { %v2232_v13 = vpop.permute.xlu1 %334  ;;  %v273_v31 = vpop.permute.xlu2 %272 }
  0x8a   : > { %v343_v15 = vsel %vm340_vm1, %v333_v9, %v2232_v13  ;;  %v347_v16 = vpop.permute.xlu0 %346 }
  0x8b   : > { %v2237_v17 = vand.u32 4294901760, %v343_v15  ;;  %v355_v18 = vsel %vm352_vm2, %v345_v10, %v347_v16 }
  0x8c   : > { %v2244_v20 = vand.u32 4294901760, %v355_v18 }
  0x8d   : > { %v2247_v21 = vsub.f32 %v343_v15, %v2237_v17 }
  0x8e   : > { %v2250_v22 = vsub.f32 %v355_v18, %v2244_v20  ;;  %373 = vmatpush.msra.mxu0 %v2244_v20  ;;  %513 = vmatpush.msra.mxu3 %v2244_v20 }
  0x8f   : > { %v414_v23 = vand.u32 4294901760, %v2247_v21 }
  0x90   : > { %375 = vmatpush.msra.mxu0 %v2237_v17  ;;  %474 = vmatpush.msra.mxu2 %v2250_v22  ;;  %v408_v24 = vand.u32 4294901760, %v2250_v22 }
  0x91   : > { %515 = vmatpush.msra.mxu3 %v2237_v17  ;;  %v2261_v26 = vpop.permute.xlu1 %310  ;;  %v415_v29 = vsub.f32 %v2247_v21, %v414_v23  ;;  %v259_v45 = vpop.permute.xlu2 %258 }
  0x92   : > { %377 = vmatpush.msra.mxu0 %v2229_v12  ;;  %477 = vmatpush.msra.mxu2 %v2247_v21  ;;  %v309_v27 = vpop.permute.xlu0 %308  ;;  %v409_v28 = vsub.f32 %v2250_v22, %v408_v24 }
  0x93   : > { %517 = vmatpush.msra.mxu3 %v2229_v12  ;;  %v319_v30 = vsel %vm316_vm3, %v309_v27, %v2261_v26  ;;  %v416_v36 = vand.u32 4294901760, %v415_v29 }
  0x94   : > { %v2275_v32 = vand.u32 4294901760, %v319_v30  ;;  %480 = vmatpush.msra.mxu2 %v2242_v19  ;;  %v410_v33 = vand.u32 4294901760, %v409_v28 }
  0x96   : > { %v2282_v35 = vsub.f32 %v319_v30, %v2275_v32  ;;  %379 = vmatpush.msra.mxu0 %v2275_v32  ;;  %411 = vmatpush.msra.mxu1 %v410_v33 }
  0x97   : > { %519 = vmatpush.msra.mxu3 %v2275_v32 }
  0x98   : > { %417 = vmatpush.msra.mxu1 %v416_v36  ;;  %483 = vmatpush.msra.mxu2 %v2282_v35  ;;  %v426_v38 = vand.u32 4294901760, %v2282_v35 }
  0x99   : > { %v2289_v39 = vpop.permute.xlu1 %348  ;;  %v2330_v57 = vpop.permute.xlu2 %300 }
  0x9a   : > { %423 = vmatpush.msra.mxu1 %v422_v37  ;;  %v299_v40 = vpop.permute.xlu0 %298  ;;  %v427_v41 = vsub.f32 %v2282_v35, %v426_v38  ;;  %v354_v54 = vsel %vm352_vm2, %v347_v16, %v2289_v39 }
  0x9b   : > { %v307_v42 = vsel %vm304_vm4, %v297_v8, %v299_v40  ;;  %v2332_v58 = vand.u32 4294901760, %v354_v54  ;;  %v306_v6 = vsel %vm304_vm4, %v299_v40, %v2330_v57 }
  0x9c   : > { %v2296_v43 = vand.u32 4294901760, %v307_v42  ;;  %v428_v44 = vand.u32 4294901760, %v427_v41  ;;  %v2377_v18 = vand.u32 4294901760, %v306_v6 }
  0x9d   : > { %v2357_v9 = vsub.f32 %v354_v54, %v2332_v58 }
  0x9e   : > { %v2299_v46 = vsub.f32 %v307_v42, %v2296_v43  ;;  %381 = vmatpush.msra.mxu0 %v2296_v43  ;;  %429 = vmatpush.msra.mxu1 %v428_v44  ;;  %v2400_v40 = vsub.f32 %v306_v6, %v2377_v18 }
  0x9f   : > { %521 = vmatpush.msra.mxu3 %v2296_v43  ;;  %v3369_v28 = vand.u32 4294901760, %v2357_v9 }
  0xa0   : > { %486 = vmatpush.msra.mxu2 %v2299_v46  ;;  %v432_v47 = vand.u32 4294901760, %v2299_v46 }
  0xa1   : > { %v2306_v48 = vpop.permute.xlu1 %336  ;;  %v2414_v54 = vpop.permute.xlu2 %262 }
  0xa2   : > { %v2308_v49 = vpop.permute.xlu0 %286  ;;  %v433_v50 = vsub.f32 %v2299_v46, %v432_v47  ;;  %v342_v56 = vsel %vm340_vm1, %v2232_v13, %v2306_v48  ;;  %v2365_v13 = vsub.f32 %v2155_v0, %v2340_v61 }
  0xa3   : > { %v295_v51 = vsel %vm292_vm5, %v285_v14, %v2308_v49  ;;  %v2342_v62 = vand.u32 4294901760, %v342_v56  ;;  %v256_v14 = vld [vmem:[%s3361_s1] sm:$0xff] }
  0xa4   : > { %v2316_v52 = vand.u32 4294901760, %v295_v51  ;;  %v434_v53 = vand.u32 4294901760, %v433_v50  ;;  %v363_v29 = vsel %vm361_vm7, %v256_v14, 0 }
  0xa5   : > { %v2371_v15 = vsub.f32 %v342_v56, %v2342_v62  ;;  %v2406_v44 = vand.u32 4294901760, %v363_v29 }
  0xa6   : > { %v2322_v55 = vsub.f32 %v295_v51, %v2316_v52  ;;  %383 = vmatpush.msra.mxu0 %v2316_v52  ;;  %435 = vmatpush.msra.mxu1 %v434_v53  ;;  %v659_v51 = vsub.f32 %v2357_v9, %v3369_v28 }
  0xa7   : > { %523 = vmatpush.msra.mxu3 %v2316_v52  ;;  %v3368_v37 = vand.u32 4294901760, %v2371_v15  ;;  %v2436_v14 = vsub.f32 %v363_v29, %v2406_v44 }
  0xa8   : > { %489 = vmatpush.msra.mxu2 %v2322_v55  ;;  %v438_v59 = vand.u32 4294901760, %v2322_v55 }
  0xa9   : > { %v2337_v60 = vpop.permute.xlu1 %324  ;;  %v665_v6 = vsub.f32 %v2371_v15, %v3368_v37 }
  0xaa   : > { %v330_v63 = vsel %vm328_vm0, %v2220_v5, %v2337_v60  ;;  %v275_v3 = vpop.permute.xlu0 %274  ;;  %v439_v4 = vsub.f32 %v2322_v55, %v438_v59 }
  0xab   : > { %v283_v8 = vsel %vm280_vm6, %v273_v31, %v275_v3  ;;  %v2359_v10 = vand.u32 4294901760, %v330_v63  ;;  %v3370_v31 = vand.u32 4294901760, %v2365_v13  ;;  %v666_v22 = vand.u32 4294901760, %v665_v6 }
  0xac   : > { %v2361_v11 = vand.u32 4294901760, %v283_v8  ;;  %v440_v5 = vand.u32 4294901760, %v439_v4  ;;  %v2477_v6 = vand.u32 4294901760, %v2436_v14 }
  0xad   : > { %v2382_v0 = vsub.f32 %v330_v63, %v2359_v10 }
  0xae   : > { %v2374_v16 = vsub.f32 %v283_v8, %v2361_v11  ;;  %385 = vmatpush.msra.mxu0 %v2361_v11  ;;  %441 = vmatpush.msra.mxu1 %v440_v5  ;;  %v682_v5 = vand.u32 4294901760, %v2400_v40 }
  0xaf   : > { %525 = vmatpush.msra.mxu3 %v2361_v11  ;;  %v3367_v53 = vand.u32 4294901760, %v2382_v0 }
  0xb0   : > { %492 = vmatpush.msra.mxu2 %v2374_v16  ;;  %v3372_v27 = vand.u32 4294901760, %v2374_v16 }
  0xb1   : > { %v2388_v30 = vpop.permute.xlu1 %312 }
  0xb2   : > { %v318_v33 = vsel %vm316_vm3, %v2261_v26, %v2388_v30  ;;  %v261_v34 = vpop.permute.xlu0 %260  ;;  %v445_v36 = vsub.f32 %v2374_v16, %v3372_v27 }
  0xb3   : > { %v2402_v41 = vand.u32 4294901760, %v318_v33  ;;  %v271_v42 = vsel %vm268_vm8, %v259_v45, %v261_v34  ;;  %v457_v45 = vsub.f32 %v2365_v13, %v3370_v31  ;;  %v270_v63 = vsel %vm268_vm8, %v261_v34, %v2414_v54 }
  0xb4   : > { %v2408_v50 = vand.u32 4294901760, %v271_v42  ;;  %v446_v26 = vand.u32 4294901760, %v445_v36  ;;  %v671_v34 = vsub.f32 %v2382_v0, %v3367_v53 }
  0xb5   : > { %v2417_v56 = vsub.f32 %v318_v33, %v2402_v41  ;;  %v660_v33 = vand.u32 4294901760, %v659_v51  ;;  %v2455_v51 = vand.u32 4294901760, %v2164_v1  ;;  %v458_v28 = vand.u32 4294901760, %v457_v45 }
  0xb6   : > { %v2426_v4 = vsub.f32 %v271_v42, %v2408_v50  ;;  %387 = vmatpush.msra.mxu0 %v2408_v50  ;;  %447 = vmatpush.msra.mxu1 %v446_v26  ;;  %v2444_v42 = vand.u32 4294901760, %v270_v63 }
  0xb7   : > { %527 = vmatpush.msra.mxu3 %v2408_v50  ;;  %v3371_v8 = vand.u32 4294901760, %v2417_v56 }
  0xb8   : > { %389 = vmatpush.msra.mxu0 %v2340_v61  ;;  %495 = vmatpush.msra.mxu2 %v2426_v4  ;;  %v450_v36 = vand.u32 4294901760, %v2426_v4  ;;  %v2483_v21 = vsub.f32 %v270_v63, %v2444_v42 }
  0xb9   : > { %529 = vmatpush.msra.mxu3 %v2340_v61  ;;  %v2449_v29 = vpop.permute.xlu1 %276  ;;  %v677_v26 = vsub.f32 %v2417_v56, %v3371_v8 }
  0xba   : > { %547 = vmatpush.msrb.mxu0 %v408_v24  ;;  %v282_v53 = vsel %vm280_vm6, %v275_v3, %v2449_v29  ;;  %v2460_v37 = vpop.permute.xlu0 %288  ;;  %498 = vmatpush.msra.mxu2 %v2365_v13  ;;  %v451_v24 = vsub.f32 %v2426_v4, %v450_v36  ;;  %v683_v3 = vsub.f32 %v2400_v40, %v682_v5  ;;  %v672_v4 = vand.u32 4294901760, %v671_v34 }
  0xbb   : > { %661 = vmatpush.msrb.mxu3 %v660_v33  ;;  %v2464_v31 = vand.u32 4294901760, %v282_v53  ;;  %v294_v8 = vsel %vm292_vm5, %v2308_v49, %v2460_v37  ;;  %v678_v27 = vand.u32 4294901760, %v677_v26  ;;  %501 = vmatmul.f32.vlgmr.msra.gmra.mxu2 %v2436_v14  ;;  %v2493_v49 = vsub.f32 %v2164_v1, %v2455_v51 }
  0xbc   : > { %551 = vmatpush.msrb.mxu0 %v414_v23  ;;  %623 = vmatpush.msrb.mxu2 %v2332_v58  ;;  %v2479_v45 = vand.u32 4294901760, %v294_v8  ;;  %v452_v33 = vand.u32 4294901760, %v451_v24  ;;  %v684_v19 = vand.u32 4294901760, %v683_v3  ;;  %v393_v1 = vsub.f32 %v2436_v14, %v2477_v6 }
  0xbd   : > { %667 = vmatpush.msrb.mxu3 %v666_v22  ;;  %v2486_v23 = vsub.f32 %v282_v53, %v2464_v31  ;;  %v700_v35 = vand.u32 4294901760, %v2483_v21 }
  0xbe   : > { %555 = vmatpush.msrb.mxu0 %v420_v25  ;;  %625 = vmatpush.msrb.mxu2 %v2342_v62  ;;  %v2496_v34 = vsub.f32 %v294_v8, %v2479_v45 }
  0xbf   : > { %673 = vmatpush.msrb.mxu3 %v672_v4  ;;  %453 = vmatpush.msra.mxu1 %v452_v33  ;;  %v694_v53 = vand.u32 4294901760, %v2486_v23 }
  0xc0   : > { %559 = vmatpush.msrb.mxu0 %v426_v38  ;;  %627 = vmatpush.msrb.mxu2 %v2359_v10  ;;  %v688_v25 = vand.u32 4294901760, %v2496_v34  ;;  %v706_v38 = vand.u32 4294901760, %v2493_v49 }
  0xc1   : > { %679 = vmatpush.msrb.mxu3 %v678_v27  ;;  %459 = vmatpush.msra.mxu1 %v458_v28  ;;  %v3373_v28 = vand.u32 4294901760, %v2374_v16 }
  0xc2   : > { %563 = vmatpush.msrb.mxu0 %v432_v47  ;;  %629 = vmatpush.msrb.mxu2 %v2402_v41  ;;  %v689_v27 = vsub.f32 %v2496_v34, %v688_v25  ;;  %v2522_v47 = vand.u32 4294901760, %v393_v1  ;;  %v707_v55 = vsub.f32 %v2493_v49, %v706_v38  ;;  %v351_v8 = vpop.permute.xlu0 %350 }
  0xc3   : > { %593 = vmatpush.msrb.mxu1 %v2244_v20  ;;  %685 = vmatpush.msrb.mxu3 %v684_v19  ;;  %v695_v20 = vsub.f32 %v2486_v23, %v694_v53  ;;  %v2680_v19 = vand.u32 4294901760, %v2179_v2 }
  0xc4   : > { %567 = vmatpush.msrb.mxu0 %v438_v59  ;;  %631 = vmatpush.msrb.mxu2 %v2377_v18  ;;  %v690_v46 = vand.u32 4294901760, %v689_v27  ;;  %v708_v63 = vand.u32 4294901760, %v707_v55 }
  0xc5   : > { %595 = vmatpush.msrb.mxu1 %v2237_v17  ;;  %533 = vmatmul.f32.vlgmr.msra.gmra.mxu3 %v2477_v6  ;;  %v701_v17 = vsub.f32 %v2483_v21, %v700_v35  ;;  %v696_v59 = vand.u32 4294901760, %v695_v20 }
  0xc6   : > { %571 = vmatpush.msrb.mxu0 %v3373_v28  ;;  %633 = vmatpush.msrb.mxu2 %v2479_v45 }
  0xc7   : > { %597 = vmatpush.msrb.mxu1 %v2229_v12  ;;  %691 = vmatpush.msrb.mxu3 %v690_v46  ;;  %v3374_v12 = vand.u32 4294901760, %v2365_v13  ;;  %v702_v16 = vand.u32 4294901760, %v701_v17  ;;  %v353_v13 = vsel %vm352_vm2, %v2289_v39, %v351_v8  ;;  %v955_v46 = vsub.f32 %v2179_v2, %v2680_v19  ;;  %v257_v2 = vld [vmem:[%s3362_s2] sm:$0xff] }
  0xc8   : > { %575 = vmatpush.msrb.mxu0 %v450_v36  ;;  %635 = vmatpush.msrb.mxu2 %v2464_v31 }
  0xc9   : > { %599 = vmatpush.msrb.mxu1 %v2275_v32  ;;  %395 = vmatmul.f32.vlgmr.msra.gmra.mxu0 %v2522_v47  ;;  %v339_v32 = vpop.permute.xlu1 %338 }
  0xca   : > { %697 = vmatpush.msrb.mxu3 %v696_v59  ;;  %579 = vmatpush.msrb.mxu0 %v3374_v12 }
  0xcb   : > { %601 = vmatpush.msrb.mxu1 %v2296_v43  ;;  %637 = vmatpush.msrb.mxu2 %v2444_v42  ;;  %v3375_v43 = vand.u32 4294901760, %v2357_v9 }
  0xcc   : > { %461 = vmatmul.f32.vlgmr.msra.gmra.mxu1 %v2406_v44  ;;  %703 = vmatpush.msrb.mxu3 %v702_v16  ;;  %v956_v16 = vand.u32 4294901760, %v955_v46 }
  0xcd   : > { %724 = vmatpush.msra.mxu0 %v2357_v9  ;;  %603 = vmatpush.msrb.mxu1 %v2316_v52  ;;  %v3376_v52 = vand.u32 4294901760, %v2371_v15  ;;  %v3377_v9 = vand.u32 4294901760, %v2382_v0 }
  0xce   : > { %639 = vmatpush.msrb.mxu2 %v2455_v51  ;;  %709 = vmatpush.msrb.mxu3 %v708_v63  ;;  %v2100_v63 = vmov 0  }
  0xcf   : > { %645 = vmatmul.f32.vlgmr.msrb.gmra.mxu2 %v2522_v47  ;;  %727 = vmatpush.msra.mxu0 %v2371_v15  ;;  %v315_v15 = vpop.permute.xlu0 %314 }
  0xd0   : > { %797 = vmatpush.msra.mxu2 %v3375_v43  ;;  %605 = vmatpush.msrb.mxu1 %v2361_v11  ;;  %v327_v11 = vpop.permute.xlu2 %326 }
  0xd1   : > { %843 = vmatpush.msra.mxu3 %v2332_v58  ;;  %730 = vmatpush.msra.mxu0 %v2382_v0  ;;  %v341_v0 = vsel %vm340_vm1, %v2306_v48, %v339_v32  ;;  %v329_v39 = vsel %vm328_vm0, %v2337_v60, %v327_v11  ;;  %v303_v36 = vpop.permute.xlu1 %302  ;;  %v317_v60 = vsel %vm316_vm3, %v2388_v30, %v315_v15 }
  0xd2   : > { %711 = vmatmul.f32.vlgmr.msrb.gmra.mxu3 %v2406_v44  ;;  %801 = vmatpush.msra.mxu2 %v3376_v52  ;;  %v2585_v48 = vand.u32 4294901760, %v341_v0 }
  0xd3   : > { %607 = vmatpush.msrb.mxu1 %v2408_v50  ;;  %845 = vmatpush.msra.mxu3 %v2342_v62  ;;  %v2578_v50 = vand.u32 4294901760, %v353_v13 }
  0xd4   : > { %581 = vmatmul.f32.vlgmr.msrb.gmra.mxu0 %v2406_v44  ;;  %805 = vmatpush.msra.mxu2 %v3377_v9  ;;  %v2606_v30 = vsub.f32 %v341_v0, %v2585_v48  ;;  %v957_v9 = vsub.f32 %v955_v46, %v956_v16 }
  0xd5   : > { %733 = vmatpush.msra.mxu0 %v2417_v56  ;;  %609 = vmatpush.msrb.mxu1 %v2340_v61  ;;  %v3378_v61 = vand.u32 4294901760, %v2417_v56  ;;  %v2611_v56 = vand.u32 4294901760, %v317_v60 }
  0xd6   : > { %847 = vmatpush.msra.mxu3 %v2359_v10  ;;  %611 = vmatmul.f32.vlgmr.msrb.gmra.mxu1 %v2406_v44  ;;  %v914_v3 = vand.u32 4294901760, %v2606_v30 }
  0xd7   : > { %736 = vmatpush.msra.mxu0 %v2400_v40  ;;  %763 = vmatpush.msra.mxu1 %v2332_v58  ;;  %v2589_v58 = vand.u32 4294901760, %v329_v39  ;;  %v305_v40 = vsel %vm304_vm4, %v2330_v57, %v303_v36  ;;  %v279_v26 = vpop.permute.xlu0 %278  ;;  %v2633_v22 = vsub.f32 %v317_v60, %v2611_v56  ;;  %v2101_v60 = vmov 0.0  }
  0xd8   : > { %809 = vmatpush.msra.mxu2 %v3378_v61  ;;  %849 = vmatpush.msra.mxu3 %v2402_v41 }
  0xd9   : > { %739 = vmatpush.msra.mxu0 %v2496_v34  ;;  %765 = vmatpush.msra.mxu1 %v2342_v62  ;;  %v2598_v62 = vsub.f32 %v353_v13, %v2578_v50  ;;  %v265_v24 = vpop.permute.xlu1 %264 }
  0xda   : > { %813 = vmatpush.msra.mxu2 %v682_v5  ;;  %851 = vmatpush.msra.mxu3 %v2377_v18 }
  0xdb   : > { %742 = vmatpush.msra.mxu0 %v2486_v23  ;;  %767 = vmatpush.msra.mxu1 %v2359_v10  ;;  %v291_v10 = vpop.permute.xlu2 %290  ;;  %v908_v5 = vand.u32 4294901760, %v2598_v62  ;;  %v915_v23 = vsub.f32 %v2606_v30, %v914_v3 }
  0xdc   : > { %817 = vmatpush.msra.mxu2 %v688_v25  ;;  %853 = vmatpush.msra.mxu3 %v2479_v45  ;;  %v293_v57 = vsel %vm292_vm5, %v2460_v37, %v291_v10  ;;  %v281_v37 = vsel %vm280_vm6, %v2449_v29, %v279_v26  ;;  %v269_v29 = vsel %vm268_vm8, %v2414_v54, %v265_v24  ;;  %v1118_v10 = vld [vmem:[%s3365_s5] sm:$0x7] }
  0xdd   : > { %745 = vmatpush.msra.mxu0 %v2483_v21  ;;  %769 = vmatpush.msra.mxu1 %v2402_v41  ;;  %v2616_v41 = vsub.f32 %v329_v39, %v2589_v58  ;;  %v2644_v4 = vand.u32 4294901760, %v293_v57  ;;  %v909_v33 = vsub.f32 %v2598_v62, %v908_v5 }
  0xde   : > { %821 = vmatpush.msra.mxu2 %v694_v53  ;;  %855 = vmatpush.msra.mxu3 %v2464_v31 }
  0xdf   : > { %748 = vmatpush.msra.mxu0 %v2493_v49  ;;  %771 = vmatpush.msra.mxu1 %v2377_v18  ;;  %v2627_v18 = vand.u32 4294901760, %v305_v40  ;;  %v926_v49 = vand.u32 4294901760, %v2633_v22  ;;  %v2673_v34 = vsub.f32 %v293_v57, %v2644_v4  ;;  %v910_v53 = vand.u32 4294901760, %v909_v33 }
  0xe0   : > { %825 = vmatpush.msra.mxu2 %v700_v35  ;;  %751 = vmatmul.f32.vlgmr.msra.gmra.mxu0 %v2436_v14  ;;  %v916_v35 = vand.u32 4294901760, %v915_v23 }
  0xe1   : > { %857 = vmatpush.msra.mxu3 %v2444_v42  ;;  %873 = vmatpush.msrb.mxu0 %v2578_v50  ;;  %v2652_v21 = vsub.f32 %v305_v40, %v2627_v18  ;;  %v938_v20 = vand.u32 4294901760, %v2673_v34  ;;  %v1120_v40 = vperm.slane %v1118_v10, 0 }
  0xe2   : > { %773 = vmatpush.msra.mxu1 %v2479_v45  ;;  %829 = vmatpush.msra.mxu2 %v706_v38  ;;  %v920_v45 = vand.u32 4294901760, %v2616_v41 }
  0xe3   : > { %859 = vmatpush.msra.mxu3 %v2455_v51  ;;  %875 = vmatpush.msrb.mxu0 %v2585_v48  ;;  %v932_v25 = vand.u32 4294901760, %v2652_v21  ;;  %v939_v59 = vsub.f32 %v2673_v34, %v938_v20 }
  0xe4   : > { %974 = vmatpush.msrb.mxu2 %v2598_v62  ;;  %775 = vmatpush.msra.mxu1 %v2464_v31  ;;  %v2659_v31 = vand.u32 4294901760, %v281_v37  ;;  %v921_v54 = vsub.f32 %v2616_v41, %v920_v45 }
  0xe5   : > { %1013 = vmatpush.msrb.mxu3 %v2578_v50  ;;  %831 = vmatmul.f32.vlgmr.msra.gmra.mxu2 %v2406_v44  ;;  %v933_v28 = vsub.f32 %v2652_v21, %v932_v25  ;;  %v940_v43 = vand.u32 4294901760, %v939_v59 }
  0xe6   : > { %877 = vmatpush.msrb.mxu0 %v2589_v58  ;;  %977 = vmatpush.msrb.mxu2 %v2606_v30  ;;  %v2686_v1 = vsub.f32 %v281_v37, %v2659_v31  ;;  %v922_v27 = vand.u32 4294901760, %v921_v54 }
  0xe7   : > { %777 = vmatpush.msra.mxu1 %v2444_v42  ;;  %1015 = vmatpush.msrb.mxu3 %v2585_v48  ;;  %v2675_v42 = vand.u32 4294901760, %v269_v29  ;;  %v934_v8 = vand.u32 4294901760, %v933_v28 }
  0xe8   : > { %861 = vmatmul.f32.vlgmr.msra.gmra.mxu3 %v2406_v44  ;;  %879 = vmatpush.msrb.mxu0 %v2611_v56  ;;  %v944_v55 = vand.u32 4294901760, %v2686_v1 }
  0xe9   : > { %980 = vmatpush.msrb.mxu2 %v2616_v41  ;;  %779 = vmatpush.msra.mxu1 %v2455_v51  ;;  %v927_v51 = vsub.f32 %v2633_v22, %v926_v49  ;;  %v949_v38 = vsub.f32 %v269_v29, %v2675_v42  ;;  %v1121_v29 = vperm.slane %v1118_v10, 1 }
  0xea   : > { %1017 = vmatpush.msrb.mxu3 %v2589_v58  ;;  %783 = vmatmul.f32.vlgmr.msra.gmra.mxu1 %v2477_v6  ;;  %v945_v32 = vsub.f32 %v2686_v1, %v944_v55 }
  0xeb   : > { %881 = vmatpush.msrb.mxu0 %v2627_v18  ;;  %911 = vmatpush.msrb.mxu1 %v910_v53  ;;  %v928_v17 = vand.u32 4294901760, %v927_v51  ;;  %v950_v12 = vand.u32 4294901760, %v949_v38 }
  0xec   : > { %983 = vmatpush.msrb.mxu2 %v2633_v22  ;;  %1019 = vmatpush.msrb.mxu3 %v2611_v56  ;;  %v946_v11 = vand.u32 4294901760, %v945_v32 }
  0xed   : > { %883 = vmatpush.msrb.mxu0 %v2644_v4  ;;  %917 = vmatpush.msrb.mxu1 %v916_v35  ;;  %v951_v52 = vsub.f32 %v949_v38, %v950_v12 }
  0xee   : > { %986 = vmatpush.msrb.mxu2 %v2652_v21  ;;  %1021 = vmatpush.msrb.mxu3 %v2627_v18 }
  0xef   : > { %885 = vmatpush.msrb.mxu0 %v2659_v31  ;;  %923 = vmatpush.msrb.mxu1 %v922_v27  ;;  %v952_v13 = vand.u32 4294901760, %v951_v52 }
  0xf0   : > { %989 = vmatpush.msrb.mxu2 %v2673_v34  ;;  %1023 = vmatpush.msrb.mxu3 %v2644_v4 }
  0xf1   : > { %887 = vmatpush.msrb.mxu0 %v2675_v42  ;;  %929 = vmatpush.msrb.mxu1 %v928_v17 }
  0xf2   : > { %992 = vmatpush.msrb.mxu2 %v2686_v1  ;;  %2082 = vset.pattern.permute.xlu2 %v2100_v63 }
  0xf3   : > { %1025 = vmatpush.msrb.mxu3 %v2659_v31  ;;  %358 = vperm.xlu2 %2082, %v257_v2  }
  0xf4   : > { %889 = vmatpush.msrb.mxu0 %v2680_v19  ;;  %935 = vmatpush.msrb.mxu1 %v934_v8 }
  0xf5   : > { %995 = vmatpush.msrb.mxu2 %v949_v38  ;;  %895 = vmatmul.f32.vlgmr.msrb.gmra.mxu0 %v2522_v47  ;;  %v958_v47 = vand.u32 4294901760, %v957_v9 }
  0xf6   : > { %1027 = vmatpush.msrb.mxu3 %v2675_v42  ;;  %1047 = vmatpush.msra.mxu0 %v908_v5 }
  0xf7   : > { %941 = vmatpush.msrb.mxu1 %v940_v43  ;;  %998 = vmatpush.msrb.mxu2 %v955_v46 }
  0xf8   : > { %1051 = vmatpush.msra.mxu0 %v914_v3  ;;  %1001 = vmatmul.f32.vlgmr.msrb.gmra.mxu2 %v2436_v14 }
  0xf9   : > { %947 = vmatpush.msrb.mxu1 %v946_v11  ;;  %1029 = vmatpush.msrb.mxu3 %v2680_v19 }
  0xfa   : > { %1055 = vmatpush.msra.mxu0 %v920_v45  ;;  %1033 = vmatmul.f32.vlgmr.msrb.gmra.mxu3 %v2477_v6 }
  0xfb   : > { %953 = vmatpush.msrb.mxu1 %v952_v13  ;;  %2083 = vset.pattern.permute.xlu0 %v2100_v63 }
  0xfc   : > { %1059 = vmatpush.msra.mxu0 %v926_v49  ;;  %1135 = vrot.lane.b32.xlu2 %v2101_v60, %s2102_s15 }
  0xfd   : > { %959 = vmatpush.msrb.mxu1 %v958_v47 }
  0xfe   : > { %961 = vmatmul.f32.vlgmr.msrb.gmra.mxu1 %v2406_v44  ;;  %1063 = vmatpush.msra.mxu0 %v932_v25 }
  0xff   : > { %1093 = vmatpush.msra.mxu1 %v2578_v50 }
 0x100   : > { %1067 = vmatpush.msra.mxu0 %v938_v20  ;;  %v1122_v20 = vperm.slane %v1118_v10, 2 }
 0x101   : > { %1095 = vmatpush.msra.mxu1 %v2585_v48 }
 0x102   : > { %1071 = vmatpush.msra.mxu0 %v944_v55 }
 0x103   : > { %1097 = vmatpush.msra.mxu1 %v2589_v58 }
 0x104   : > { %1075 = vmatpush.msra.mxu0 %v950_v12 }
 0x105   : > { %1099 = vmatpush.msra.mxu1 %v2611_v56 }
 0x106   : > { %1079 = vmatpush.msra.mxu0 %v956_v16 }
 0x107   : > { %1101 = vmatpush.msra.mxu1 %v2627_v18  ;;  %1081 = vmatmul.f32.vlgmr.msra.gmra.mxu0 %v2406_v44 }
 0x109   : > { %1103 = vmatpush.msra.mxu1 %v2644_v4 }
 0x10b   : > { %1105 = vmatpush.msra.mxu1 %v2659_v31 }
 0x10d   : > { %1107 = vmatpush.msra.mxu1 %v2675_v42 }
 0x10f   : > { %1109 = vmatpush.msra.mxu1 %v2680_v19 }
 0x110   : > { %1111 = vmatmul.f32.vlgmr.msra.gmra.mxu1 %v2406_v44 }
 0x13e   : > { %v502_v39 = vpop.f32.mrf.mxu2 }
 0x146   : > { %v396_v14 = vpop.f32.mrf.mxu0 }
 0x148   : > { %v534_v36 = vpop.f32.mrf.mxu3 }
 0x149   : > { %v462_v6 = vpop.f32.mrf.mxu1 }
 0x14d   : > { %v359_v15 = vpop.permute.xlu2 %358 }
 0x14e   : > { %v397_v0 = vadd.f32 %v396_v14, %v359_v15 }
 0x150   : > { %v463_v61 = vadd.f32 %v462_v6, %v397_v0 }
 0x151   : > { %v582_v48 = vpop.f32.mrf.mxu0 }
 0x152   : > { %v503_v50 = vadd.f32 %v502_v39, %v463_v61  ;;  %v646_v5 = vpop.f32.mrf.mxu2 }
 0x153   : > { %v612_v62 = vpop.f32.mrf.mxu1  ;;  %v647_v26 = vadd.f32 %v646_v5, %v359_v15 }
 0x154   : > { %v535_v58 = vadd.f32 %v534_v36, %v503_v50 }
 0x155   : > { %v712_v57 = vpop.f32.mrf.mxu3 }
 0x156   : > { %v583_v44 = vadd.f32 %v582_v48, %v535_v58  ;;  %v713_v22 = vadd.f32 %v712_v57, %v647_v26  ;;  %v1136_v17 = vpop.permute.xlu2 %1135 }
 0x158   : > { %v613_v30 = vadd.f32 %v612_v62, %v583_v44 }
 0x15a   : > { %v1115_v56 = vmax.f32 %v613_v30, 0.0 }
 0x15c   : > { %v1126_v41 = vmul.f32 %v1120_v40, %v1115_v56  ;;  %v1142_v40 = vld [vmem:[%s3363_s3] sm:$0xff] }
 0x15d   : > { %v752_v18 = vpop.f32.mrf.mxu0 }
 0x15e   : > { %1129 = vrot.lane.b32.xlu0 %v1126_v41, %s2102_s15  ;;  %v753_v24 = vadd.f32 %v752_v18, %v713_v22  ;;  %v1238_v18 = vsel %vm361_vm7, %v1142_v40, 0 }
 0x167   : > { %v784_v3 = vpop.f32.mrf.mxu1 }
 0x168   : > { %v785_v37 = vadd.f32 %v784_v3, %v753_v24  ;;  %v832_v45 = vpop.f32.mrf.mxu2 }
 0x16a   : > { %v833_v4 = vadd.f32 %v832_v45, %v785_v37 }
 0x16b   : > { %v862_v33 = vpop.f32.mrf.mxu3 }
 0x16c   : > { %v863_v21 = vadd.f32 %v862_v33, %v833_v4  ;;  %v2882_v33 = vand.u32 4294901760, %v1238_v18 }
 0x16e   : > { %v1116_v31 = vmax.f32 %v863_v21, 0.0 }
 0x170   : > { %v1127_v23 = vmul.f32 %v1121_v29, %v1116_v31 }
 0x172   : > { %1131 = vrot.lane.b32.xlu1 %v1127_v23, %s2102_s15  ;;  %v896_v49 = vpop.f32.mrf.mxu0 }
 0x173   : > { %v897_v34 = vadd.f32 %v896_v49, %v359_v15 }
 0x17b   : > { %v962_v54 = vpop.f32.mrf.mxu1  ;;  %v1002_v53 = vpop.f32.mrf.mxu2 }
 0x17c   : > { %v963_v42 = vadd.f32 %v962_v54, %v897_v34 }
 0x17d   : > { %v1034_v25 = vpop.f32.mrf.mxu3 }
 0x17e   : > { %v1003_v19 = vadd.f32 %v1002_v53, %v963_v42 }
 0x180   : > { %v1035_v35 = vadd.f32 %v1034_v25, %v1003_v19 }
 0x184   : > { %v1082_v1 = vpop.f32.mrf.mxu0 }
 0x185   : > { %v1083_v51 = vadd.f32 %v1082_v1, %v1035_v35 }
 0x18d   : > { %v1112_v38 = vpop.f32.mrf.mxu1 }
 0x18e   : > { %v1113_v27 = vadd.f32 %v1112_v38, %v1083_v51  ;;  %v2923_v38 = vsub.f32 %v1238_v18, %v2882_v33 }
 0x190   : > { %v1117_v46 = vmax.f32 %v1113_v27, 0.0 }
 0x192   : > { %v1128_v28 = vmul.f32 %v1122_v20, %v1117_v46 }
 0x194   : > { %1133 = vrot.lane.b32.xlu0 %v1128_v28, %s2102_s15 }
 0x1d0   : > { %v1130_v55 = vpop.permute.xlu0 %1129 }
 0x1d1   : > { %v2750_v2 = vsel %vm1137_vm9, %v1136_v17, %v1130_v55 }
 0x1d2   : > { %1199 = vrot.lane.b32.xlu2 %v2750_v2, %s2092_s27  ;;  %1210 = vrot.lane.b32.xlu0 %v2750_v2, %s2093_s28 }
 0x1d3   : > { %1221 = vrot.lane.b32.xlu1 %v2750_v2, %s2094_s29 }
 0x1da   : > { %1166 = vrot.lane.b32.xlu2 %v2750_v2, %s2097_s8  ;;  %1177 = vrot.lane.b32.xlu0 %v2750_v2, %s2095_s30 }
 0x1db   : > { %1188 = vrot.lane.b32.xlu1 %v2750_v2, %s2096_s7 }
 0x1e2   : > { %1144 = vrot.lane.b32.xlu0 %v2750_v2, %s2099_s10 }
 0x1e3   : > { %1155 = vrot.lane.b32.xlu1 %v2750_v2, %s2098_s9 }
 0x1e4   : > { %v1132_v59 = vpop.permute.xlu1 %1131 }
 0x1e5   : > { %v2770_v12 = vsel %vm1137_vm9, %v1130_v55, %v1132_v59 }
 0x1e6   : > { %1223 = vrot.lane.b32.xlu2 %v2770_v12, %s2094_s29 }
 0x1ea   : > { %1201 = vrot.lane.b32.xlu0 %v2770_v12, %s2092_s27 }
 0x1eb   : > { %1212 = vrot.lane.b32.xlu1 %v2770_v12, %s2093_s28 }
 0x1ee   : > { %1190 = vrot.lane.b32.xlu2 %v2770_v12, %s2096_s7 }
 0x1f2   : > { %1168 = vrot.lane.b32.xlu0 %v2770_v12, %s2097_s8 }
 0x1f3   : > { %1179 = vrot.lane.b32.xlu1 %v2770_v12, %s2095_s30 }
 0x1f6   : > { %1157 = vrot.lane.b32.xlu2 %v2770_v12, %s2098_s9 }
 0x1fb   : > { %1146 = vrot.lane.b32.xlu1 %v2770_v12, %s2099_s10 }
 0x206   : > { %v1134_v16 = vpop.permute.xlu0 %1133 }
 0x207   : > { %v2790_v63 = vsel %vm1137_vm9, %v1132_v59, %v1134_v16  ;;  %v1138_v8 = vsel %vm1137_vm9, %v1134_v16, %v1136_v17  ;;  %v2936_v17 = vand.u32 4294901760, %v2750_v2 }
 0x208   : > { %1203 = vrot.lane.b32.xlu1 %v2790_v63, %s2092_s27  ;;  %1214 = vrot.lane.b32.xlu0 %v2790_v63, %s2093_s28 }
 0x209   : > { %1225 = vrot.lane.b32.xlu2 %v2790_v63, %s2094_s29 }
 0x210   : > { %1181 = vrot.lane.b32.xlu0 %v2790_v63, %s2095_s30  ;;  %1227 = vrot.lane.b32.xlu1 %v1138_v8, %s2094_s29 }
 0x211   : > { %1192 = vrot.lane.b32.xlu2 %v2790_v63, %s2096_s7 }
 0x218   : > { %1216 = vrot.lane.b32.xlu0 %v1138_v8, %s2093_s28  ;;  %1159 = vrot.lane.b32.xlu1 %v2790_v63, %s2098_s9 }
 0x219   : > { %1170 = vrot.lane.b32.xlu2 %v2790_v63, %s2097_s8 }
 0x220   : > { %1148 = vrot.lane.b32.xlu0 %v2790_v63, %s2099_s10  ;;  %1194 = vrot.lane.b32.xlu1 %v1138_v8, %s2096_s7 }
 0x221   : > { %1205 = vrot.lane.b32.xlu2 %v1138_v8, %s2092_s27  ;;  %s251_s27 = scalar_lea.vmem %s3366_s6, %s2062_s24 }
 0x228   : > { %1172 = vrot.lane.b32.xlu0 %v1138_v8, %s2097_s8  ;;  %1161 = vrot.lane.b32.xlu1 %v1138_v8, %s2098_s9 }
 0x229   : > { %1183 = vrot.lane.b32.xlu2 %v1138_v8, %s2095_s30 }
 0x22c   : > { %v1200_v32 = vpop.permute.xlu2 %1199 }
 0x231   : > { %1150 = vrot.lane.b32.xlu2 %v1138_v8, %s2099_s10 }
 0x234   : > { %v1167_v43 = vpop.permute.xlu2 %1166 }
 0x240   : > { %v1224_v9 = vpop.permute.xlu2 %1223 }
 0x244   : > { %v1211_v52 = vpop.permute.xlu0 %1210 }
 0x245   : > { %v1222_v11 = vpop.permute.xlu1 %1221 }
 0x246   : > { %v1231_v13 = vsel %vm352_vm2, %v1222_v11, %v1224_v9 }
 0x247   : > { %v2820_v47 = vand.u32 4294901760, %v1231_v13 }
 0x248   : > { %v2832_v50 = vpop.permute.xlu2 %1190 }
 0x249   : > { %v2823_v14 = vsub.f32 %v1231_v13, %v2820_v47  ;;  %1248 = vmatpush.msra.mxu2 %v2820_v47  ;;  %1388 = vmatpush.msrb.mxu1 %v2820_v47  ;;  %v2960_v13 = vsub.f32 %v2750_v2, %v2936_v17 }
 0x24b   : > { %v1283_v6 = vand.u32 4294901760, %v2823_v14  ;;  %1349 = vmatpush.msrb.mxu0 %v2823_v14  ;;  %v1331_v40 = vand.u32 4294901760, %v2960_v13 }
 0x24c   : > { %v1178_v15 = vpop.permute.xlu0 %1177 }
 0x24d   : > { %v1284_v0 = vsub.f32 %v2823_v14, %v1283_v6  ;;  %v1189_v61 = vpop.permute.xlu1 %1188 }
 0x24e   : > { %v1198_v58 = vsel %vm316_vm3, %v1189_v61, %v2832_v50 }
 0x24f   : > { %v1285_v39 = vand.u32 4294901760, %v1284_v0  ;;  %v2839_v60 = vand.u32 4294901760, %v1198_v58 }
 0x250   : > { %v2841_v62 = vpop.permute.xlu2 %1157 }
 0x251   : > { %1286 = vmatpush.msra.mxu3 %v1285_v39  ;;  %v2859_v5 = vsub.f32 %v1198_v58, %v2839_v60 }
 0x253   : > { %v1301_v4 = vand.u32 4294901760, %v2859_v5 }
 0x254   : > { %v2834_v36 = vpop.permute.xlu0 %1144 }
 0x255   : > { %v1156_v48 = vpop.permute.xlu1 %1155  ;;  %v1302_v51 = vsub.f32 %v2859_v5, %v1301_v4 }
 0x256   : > { %v1165_v22 = vsel %vm280_vm6, %v1156_v48, %v2841_v62 }
 0x257   : > { %v2884_v21 = vand.u32 4294901760, %v1165_v22  ;;  %v1303_v16 = vand.u32 4294901760, %v1302_v51 }
 0x259   : > { %v2926_v27 = vsub.f32 %v1165_v22, %v2884_v21 }
 0x25c   : > { %v2843_v10 = vpop.permute.xlu0 %1201 }
 0x25d   : > { %v2845_v44 = vpop.permute.xlu1 %1212  ;;  %v1209_v30 = vsel %vm328_vm0, %v1200_v32, %v2843_v10  ;;  %v1319_v32 = vand.u32 4294901760, %v2926_v27 }
 0x25e   : > { %v1220_v56 = vsel %vm340_vm1, %v1211_v52, %v2845_v44  ;;  %v2856_v41 = vand.u32 4294901760, %v1209_v30 }
 0x25f   : > { %v2861_v26 = vand.u32 4294901760, %v1220_v56  ;;  %v1320_v2 = vsub.f32 %v2926_v27, %v1319_v32 }
 0x260   : > { %v2864_v57 = vsub.f32 %v1209_v30, %v2856_v41 }
 0x261   : > { %v2871_v24 = vsub.f32 %v1220_v56, %v2861_v26  ;;  %1250 = vmatpush.msra.mxu2 %v2861_v26  ;;  %1390 = vmatpush.msrb.mxu1 %v2861_v26  ;;  %v1321_v22 = vand.u32 4294901760, %v1320_v2 }
 0x262   : > { %v1295_v3 = vand.u32 4294901760, %v2864_v57 }
 0x263   : > { %v2876_v37 = vpop.permute.xlu2 %1225  ;;  %1252 = vmatpush.msra.mxu2 %v2856_v41  ;;  %1352 = vmatpush.msrb.mxu0 %v2871_v24  ;;  %v1289_v45 = vand.u32 4294901760, %v2871_v24 }
 0x264   : > { %v1230_v29 = vsel %vm352_vm2, %v1224_v9, %v2876_v37  ;;  %1392 = vmatpush.msrb.mxu1 %v2856_v41  ;;  %v2890_v31 = vpop.permute.xlu0 %1168  ;;  %v1296_v42 = vsub.f32 %v2864_v57, %v1295_v3 }
 0x265   : > { %v2892_v23 = vand.u32 4294901760, %v1230_v29  ;;  %v2894_v49 = vpop.permute.xlu1 %1179  ;;  %1254 = vmatpush.msra.mxu2 %v2839_v60  ;;  %1355 = vmatpush.msrb.mxu0 %v2864_v57  ;;  %v1176_v54 = vsel %vm292_vm5, %v1167_v43, %v2890_v31  ;;  %v1290_v34 = vsub.f32 %v2871_v24, %v1289_v45  ;;  %v2947_v43 = vand.u32 4294901760, %v2923_v38 }
 0x266   : > { %v1187_v53 = vsel %vm304_vm4, %v1178_v15, %v2894_v49  ;;  %1394 = vmatpush.msrb.mxu1 %v2839_v60  ;;  %v2911_v19 = vand.u32 4294901760, %v1176_v54  ;;  %v1297_v28 = vand.u32 4294901760, %v1296_v42  ;;  %v1332_v42 = vsub.f32 %v2960_v13, %v1331_v40 }
 0x267   : > { %v2914_v25 = vsub.f32 %v1230_v29, %v2892_v23  ;;  %v2916_v1 = vand.u32 4294901760, %v1187_v53  ;;  %1358 = vmatpush.msrb.mxu0 %v2859_v5  ;;  %v1291_v35 = vand.u32 4294901760, %v1290_v34 }
 0x268   : > { %v2929_v20 = vsub.f32 %v1176_v54, %v2911_v19 }
 0x269   : > { %v2932_v46 = vsub.f32 %v1187_v53, %v2916_v1  ;;  %1256 = vmatpush.msra.mxu2 %v2916_v1  ;;  %1292 = vmatpush.msra.mxu3 %v1291_v35  ;;  %v1533_v59 = vand.u32 4294901760, %v2914_v25 }
 0x26a   : > { %1396 = vmatpush.msrb.mxu1 %v2916_v1  ;;  %v1313_v55 = vand.u32 4294901760, %v2929_v20 }
 0x26b   : > { %1258 = vmatpush.msra.mxu2 %v2911_v19  ;;  %1298 = vmatpush.msra.mxu3 %v1297_v28  ;;  %v1307_v8 = vand.u32 4294901760, %v2932_v46  ;;  %v2962_v15 = vpop.permute.xlu2 %1192  ;;  %v1534_v61 = vsub.f32 %v2914_v25, %v1533_v59 }
 0x26c   : > { %1361 = vmatpush.msrb.mxu0 %v2932_v46  ;;  %1398 = vmatpush.msrb.mxu1 %v2911_v19  ;;  %v1314_v11 = vsub.f32 %v2929_v20, %v1313_v55  ;;  %v1197_v54 = vsel %vm316_vm3, %v2832_v50, %v2962_v15 }
 0x26d   : > { %v2949_v52 = vpop.permute.xlu1 %1146  ;;  %1260 = vmatpush.msra.mxu2 %v2884_v21  ;;  %1304 = vmatpush.msra.mxu3 %v1303_v16  ;;  %v1308_v9 = vsub.f32 %v2932_v46, %v1307_v8  ;;  %v1535_v56 = vand.u32 4294901760, %v1534_v61  ;;  %v3007_v50 = vand.u32 4294901760, %v1197_v54 }
 0x26e   : > { %v1154_v0 = vsel %vm268_vm8, %v2834_v36, %v2949_v52  ;;  %1364 = vmatpush.msrb.mxu0 %v2929_v20  ;;  %1400 = vmatpush.msrb.mxu1 %v2884_v21  ;;  %v1268_v36 = vsub.f32 %v2923_v38, %v2947_v43  ;;  %v1315_v30 = vand.u32 4294901760, %v1314_v11 }
 0x26f   : > { %v2973_v39 = vand.u32 4294901760, %v1154_v0  ;;  %v1309_v48 = vand.u32 4294901760, %v1308_v9 }
 0x270   : > { %1367 = vmatpush.msrb.mxu0 %v2926_v27  ;;  %v2991_v29 = vand.u32 4294901760, %v1268_v36 }
 0x271   : > { %v2982_v58 = vsub.f32 %v1154_v0, %v2973_v39  ;;  %1262 = vmatpush.msra.mxu2 %v2973_v39  ;;  %1310 = vmatpush.msra.mxu3 %v1309_v48 }
 0x272   : > { %1402 = vmatpush.msrb.mxu1 %v2973_v39 }
 0x273   : > { %1264 = vmatpush.msra.mxu2 %v2936_v17  ;;  %1316 = vmatpush.msra.mxu3 %v1315_v30  ;;  %v1325_v18 = vand.u32 4294901760, %v2982_v58  ;;  %v3009_v14 = vpop.permute.xlu2 %1170 }
 0x274   : > { %1370 = vmatpush.msrb.mxu0 %v2982_v58  ;;  %1404 = vmatpush.msrb.mxu1 %v2936_v17 }
 0x275   : > { %1422 = vmatpush.msrb.mxu2 %v1283_v6  ;;  %v1326_v34 = vsub.f32 %v2982_v58, %v1325_v18  ;;  %1322 = vmatpush.msra.mxu3 %v1321_v22  ;;  %v1333_v6 = vand.u32 4294901760, %v1332_v42 }
 0x276   : > { %1536 = vmatpush.msra.mxu1 %v1535_v56  ;;  %1373 = vmatpush.msrb.mxu0 %v2960_v13  ;;  %v3123_v56 = vand.u32 4294901760, %v2770_v12 }
 0x277   : > { %1426 = vmatpush.msrb.mxu2 %v1289_v45  ;;  %v1327_v53 = vand.u32 4294901760, %v1326_v34  ;;  %1376 = vmatmul.f32.vlgmr.msrb.gmra.mxu0 %v2923_v38  ;;  %v1175_v45 = vsel %vm292_vm5, %v2890_v31, %v3009_v14 }
 0x278   : > { %1498 = vmatpush.msra.mxu0 %v2892_v23  ;;  %1270 = vmatmul.f32.vlgmr.msra.gmra.mxu2 %v2991_v29  ;;  %v3147_v42 = vsub.f32 %v2770_v12, %v3123_v56 }
 0x279   : > { %1430 = vmatpush.msrb.mxu2 %v1295_v3  ;;  %1328 = vmatpush.msra.mxu3 %v1327_v53  ;;  %v3035_v3 = vsub.f32 %v1197_v54, %v3007_v50 }
 0x27a   : > { %v3015_v35 = vpop.permute.xlu1 %1203  ;;  %v3017_v24 = vpop.permute.xlu0 %1214  ;;  %1408 = vmatmul.f32.vlgmr.msrb.gmra.mxu1 %v2947_v43 }
 0x27b   : > { %v1208_v51 = vsel %vm328_vm0, %v2843_v10, %v3015_v35  ;;  %v1219_v57 = vsel %vm340_vm1, %v2845_v44, %v3017_v24  ;;  %1434 = vmatpush.msrb.mxu2 %v1301_v4  ;;  %1334 = vmatpush.msra.mxu3 %v1333_v6  ;;  %v3045_v10 = vand.u32 4294901760, %v1175_v45  ;;  %v1551_v16 = vand.u32 4294901760, %v3035_v3  ;;  %v1206_v11 = vpop.permute.xlu2 %1205 }
 0x27c   : > { %v3037_v28 = vand.u32 4294901760, %v1208_v51  ;;  %v3039_v31 = vand.u32 4294901760, %v1219_v57  ;;  %1336 = vmatmul.f32.vlgmr.msra.gmra.mxu3 %v2882_v33 }
 0x27d   : > { %1468 = vmatpush.msrb.mxu3 %v2820_v47  ;;  %1438 = vmatpush.msrb.mxu2 %v1307_v8  ;;  %v1143_v47 = vld [vmem:[%s3364_s4] sm:$0xff] }
 0x27e   : > { %v3048_v44 = vsub.f32 %v1208_v51, %v3037_v28  ;;  %v3051_v5 = vsub.f32 %v1219_v57, %v3039_v31  ;;  %1500 = vmatpush.msra.mxu0 %v3039_v31  ;;  %1234 = vperm.xlu0 %2083, %v1143_v47  }
 0x27f   : > { %1470 = vmatpush.msrb.mxu3 %v2861_v26  ;;  %1442 = vmatpush.msrb.mxu2 %v1313_v55  ;;  %v3068_v26 = vsub.f32 %v1175_v45, %v3045_v10 }
 0x280   : > { %1502 = vmatpush.msra.mxu0 %v3037_v28  ;;  %v1539_v4 = vand.u32 4294901760, %v3051_v5  ;;  %v1545_v46 = vand.u32 4294901760, %v3048_v44 }
 0x281   : > { %1472 = vmatpush.msrb.mxu3 %v2856_v41  ;;  %1446 = vmatpush.msrb.mxu2 %v1319_v32  ;;  %v1563_v61 = vand.u32 4294901760, %v3068_v26 }
 0x282   : > { %v1228_v8 = vpop.permute.xlu1 %1227  ;;  %1504 = vmatpush.msra.mxu0 %v3007_v50  ;;  %v1182_v20 = vpop.permute.xlu0 %1181  ;;  %v1540_v41 = vsub.f32 %v3051_v5, %v1539_v4  ;;  %v1546_v55 = vsub.f32 %v3048_v44, %v1545_v46 }
 0x283   : > { %1474 = vmatpush.msrb.mxu3 %v2839_v60  ;;  %v1186_v27 = vsel %vm304_vm4, %v2894_v49, %v1182_v20  ;;  %1450 = vmatpush.msrb.mxu2 %v1325_v18  ;;  %v1552_v60 = vsub.f32 %v3035_v3, %v1551_v16  ;;  %v1184_v18 = vpop.permute.xlu2 %1183 }
 0x284   : > { %v3081_v32 = vand.u32 4294901760, %v1186_v27  ;;  %v1541_v9 = vand.u32 4294901760, %v1540_v41  ;;  %v1547_v49 = vand.u32 4294901760, %v1546_v55  ;;  %v1185_v53 = vsel %vm304_vm4, %v1182_v20, %v1184_v18 }
 0x285   : > { %1476 = vmatpush.msrb.mxu3 %v2916_v1  ;;  %1454 = vmatpush.msrb.mxu2 %v1331_v40  ;;  %v1553_v1 = vand.u32 4294901760, %v1552_v60  ;;  %v3176_v55 = vand.u32 4294901760, %v1185_v53 }
 0x286   : > { %v3090_v0 = vsub.f32 %v1186_v27, %v3081_v32  ;;  %1506 = vmatpush.msra.mxu0 %v3081_v32  ;;  %1542 = vmatpush.msra.mxu1 %v1541_v9 }
 0x287   : > { %1599 = vmatpush.msra.mxu2 %v2914_v25  ;;  %1478 = vmatpush.msrb.mxu3 %v2911_v19  ;;  %v1564_v19 = vsub.f32 %v3068_v26, %v1563_v61 }
 0x288   : > { %1508 = vmatpush.msra.mxu0 %v3045_v10  ;;  %1548 = vmatpush.msra.mxu1 %v1547_v49  ;;  %v1557_v13 = vand.u32 4294901760, %v3090_v0 }
 0x289   : > { %1602 = vmatpush.msra.mxu2 %v3051_v5  ;;  %1480 = vmatpush.msrb.mxu3 %v2884_v21  ;;  %v1229_v21 = vsel %vm352_vm2, %v2876_v37, %v1228_v8  ;;  %v1565_v37 = vand.u32 4294901760, %v1564_v19 }
 0x28a   : > { %v3100_v48 = vpop.permute.xlu1 %1159  ;;  %1554 = vmatpush.msra.mxu1 %v1553_v1  ;;  %v1217_v2 = vpop.permute.xlu0 %1216  ;;  %v1558_v36 = vsub.f32 %v3090_v0, %v1557_v13  ;;  %1456 = vmatmul.f32.vlgmr.msrb.gmra.mxu2 %v2882_v33  ;;  %v3132_v22 = vand.u32 4294901760, %v1229_v21 }
 0x28b   : > { %v1164_v58 = vsel %vm280_vm6, %v2841_v62, %v3100_v48  ;;  %1605 = vmatpush.msra.mxu2 %v3048_v44  ;;  %1482 = vmatpush.msrb.mxu3 %v2973_v39  ;;  %v1218_v39 = vsel %vm340_vm1, %v3017_v24, %v1217_v2 }
 0x28c   : > { %v3118_v30 = vand.u32 4294901760, %v1164_v58  ;;  %v1559_v40 = vand.u32 4294901760, %v1558_v36  ;;  %v3141_v34 = vand.u32 4294901760, %v1218_v39  ;;  %v3157_v51 = vsub.f32 %v1229_v21, %v3132_v22 }
 0x28d   : > { %1608 = vmatpush.msra.mxu2 %v3035_v3  ;;  %1484 = vmatpush.msrb.mxu3 %v2936_v17  ;;  %v1207_v17 = vsel %vm328_vm0, %v3015_v35, %v1206_v11  ;;  %v1151_v11 = vpop.permute.xlu2 %1150  ;;  %v3201_v36 = vsub.f32 %v1185_v53, %v3176_v55 }
 0x28e   : > { %v3126_v62 = vsub.f32 %v1164_v58, %v3118_v30  ;;  %1510 = vmatpush.msra.mxu0 %v3118_v30  ;;  %1560 = vmatpush.msra.mxu1 %v1559_v40  ;;  %v3154_v45 = vand.u32 4294901760, %v1207_v17  ;;  %v3170_v20 = vsub.f32 %v1218_v39, %v3141_v34  ;;  %v1783_v9 = vand.u32 4294901760, %v3157_v51 }
 0x28f   : > { %1611 = vmatpush.msra.mxu2 %v3090_v0  ;;  %1638 = vmatpush.msra.mxu3 %v2892_v23 }
 0x290   : > { %1566 = vmatpush.msra.mxu1 %v1565_v37  ;;  %v1569_v54 = vand.u32 4294901760, %v3126_v62  ;;  %1486 = vmatmul.f32.vlgmr.msrb.gmra.mxu3 %v2882_v33  ;;  %v3183_v27 = vsub.f32 %v1207_v17, %v3154_v45  ;;  %v1789_v2 = vand.u32 4294901760, %v3170_v20 }
 0x291   : > { %1614 = vmatpush.msra.mxu2 %v3068_v26  ;;  %1640 = vmatpush.msra.mxu3 %v3039_v31 }
 0x292   : > { %v1195_v6 = vpop.permute.xlu1 %1194  ;;  %v1149_v35 = vpop.permute.xlu0 %1148  ;;  %v1570_v24 = vsub.f32 %v3126_v62, %v1569_v54  ;;  %v1795_v37 = vand.u32 4294901760, %v3183_v27  ;;  %v1790_v7 = vsub.f32 %v3170_v20, %v1789_v2 }
 0x293   : > { %v1196_v57 = vsel %vm316_vm3, %v2962_v15, %v1195_v6  ;;  %v1153_v12 = vsel %vm268_vm8, %v2949_v52, %v1149_v35  ;;  %1617 = vmatpush.msra.mxu2 %v3126_v62  ;;  %1642 = vmatpush.msra.mxu3 %v3037_v28  ;;  %v1581_v15 = vand.u32 4294901760, %v3147_v42  ;;  %v1152_v19 = vsel %vm268_vm8, %v1149_v35, %v1151_v11 }
 0x294   : > { %v3167_v47 = vand.u32 4294901760, %v1153_v12  ;;  %v1571_v8 = vand.u32 4294901760, %v1570_v24  ;;  %v3172_v41 = vand.u32 4294901760, %v1196_v57  ;;  %v3228_v6 = vand.u32 4294901760, %v1152_v19 }
 0x295   : > { %1644 = vmatpush.msra.mxu3 %v3007_v50  ;;  %v1582_v1 = vsub.f32 %v3147_v42, %v1581_v15  ;;  %v1807_v24 = vand.u32 4294901760, %v3201_v36 }
 0x296   : > { %v3179_v52 = vsub.f32 %v1153_v12, %v3167_v47  ;;  %1512 = vmatpush.msra.mxu0 %v3167_v47  ;;  %1572 = vmatpush.msra.mxu1 %v1571_v8  ;;  %v3191_v49 = vsub.f32 %v1196_v57, %v3172_v41  ;;  %v3256_v57 = vsub.f32 %v1152_v19, %v3228_v6  ;;  %v1791_v12 = vand.u32 4294901760, %v1790_v7 }
 0x297   : > { %1646 = vmatpush.msra.mxu3 %v3081_v32  ;;  %v1808_v0 = vsub.f32 %v3201_v36, %v1807_v24 }
 0x298   : > { %1514 = vmatpush.msra.mxu0 %v3123_v56  ;;  %1620 = vmatpush.msra.mxu2 %v3179_v52  ;;  %v1575_v60 = vand.u32 4294901760, %v3179_v52 }
 0x299   : > { %1648 = vmatpush.msra.mxu3 %v3045_v10  ;;  %1520 = vmatmul.f32.vlgmr.msra.gmra.mxu0 %v2991_v29 }
 0x29a   : > { %1672 = vmatpush.msrb.mxu0 %v1533_v59  ;;  %v1162_v58 = vpop.permute.xlu1 %1161  ;;  %1623 = vmatpush.msra.mxu2 %v3147_v42  ;;  %v1173_v21 = vpop.permute.xlu0 %1172  ;;  %v1576_v25 = vsub.f32 %v3179_v52, %v1575_v60  ;;  %v1784_v59 = vsub.f32 %v3157_v51, %v1783_v9 }
 0x29b   : > { %v1163_v40 = vsel %vm280_vm6, %v3100_v48, %v1162_v58  ;;  %v1174_v39 = vsel %vm292_vm5, %v3009_v14, %v1173_v21  ;;  %1650 = vmatpush.msra.mxu3 %v3118_v30  ;;  %v1801_v14 = vand.u32 4294901760, %v3191_v49  ;;  %v3242_v48 = vand.u32 4294901760, %v2790_v63  ;;  %1626 = vmatmul.f32.vlgmr.msra.gmra.mxu2 %v2923_v38 }
 0x29c   : > { %1676 = vmatpush.msrb.mxu0 %v1539_v4  ;;  %v3223_v18 = vand.u32 4294901760, %v1163_v40  ;;  %v3225_v17 = vand.u32 4294901760, %v1174_v39  ;;  %1748 = vmatpush.msrb.mxu2 %v3132_v22  ;;  %v1577_v53 = vand.u32 4294901760, %v1576_v25  ;;  %v1583_v4 = vand.u32 4294901760, %v1582_v1 }
 0x29d   : > { %1652 = vmatpush.msra.mxu3 %v3167_v47  ;;  %v1785_v44 = vand.u32 4294901760, %v1784_v59  ;;  %v1802_v3 = vsub.f32 %v3191_v49, %v1801_v14  ;;  %v3274_v11 = vsub.f32 %v2790_v63, %v3242_v48  ;;  %v1809_v63 = vand.u32 4294901760, %v1808_v0 }
 0x29e   : > { %1680 = vmatpush.msrb.mxu0 %v1545_v46  ;;  %v3238_v5 = vsub.f32 %v1174_v39, %v3225_v17  ;;  %1750 = vmatpush.msrb.mxu2 %v3141_v34  ;;  %v3245_v35 = vsub.f32 %v1163_v40, %v3223_v18  ;;  %v1796_v46 = vsub.f32 %v3183_v27, %v1795_v37 }
 0x29f   : > { %1578 = vmatpush.msra.mxu1 %v1577_v53  ;;  %1654 = vmatpush.msra.mxu3 %v3123_v56  ;;  %v1831_v62 = vand.u32 4294901760, %v3274_v11 }
 0x2a0   : > { %1684 = vmatpush.msrb.mxu0 %v1551_v16  ;;  %1752 = vmatpush.msrb.mxu2 %v3154_v45  ;;  %v1813_v16 = vand.u32 4294901760, %v3238_v5  ;;  %v1797_v8 = vand.u32 4294901760, %v1796_v46 }
 0x2a1   : > { %1584 = vmatpush.msra.mxu1 %v1583_v4  ;;  %1786 = vmatpush.msrb.mxu3 %v1785_v44 }
 0x2a2   : > { %1688 = vmatpush.msrb.mxu0 %v1557_v13  ;;  %1754 = vmatpush.msrb.mxu2 %v3172_v41  ;;  %v1819_v13 = vand.u32 4294901760, %v3245_v35  ;;  %v1814_v26 = vsub.f32 %v3238_v5, %v1813_v16 }
 0x2a3   : > { %1718 = vmatpush.msrb.mxu1 %v2892_v23  ;;  %1792 = vmatpush.msrb.mxu3 %v1791_v12  ;;  %v1803_v23 = vand.u32 4294901760, %v1802_v3 }
 0x2a4   : > { %1692 = vmatpush.msrb.mxu0 %v1563_v61  ;;  %1756 = vmatpush.msrb.mxu2 %v3176_v55  ;;  %v1825_v61 = vand.u32 4294901760, %v3256_v57 }
 0x2a5   : > { %1720 = vmatpush.msrb.mxu1 %v3039_v31  ;;  %1798 = vmatpush.msrb.mxu3 %v1797_v8  ;;  %v1820_v31 = vsub.f32 %v3245_v35, %v1819_v13 }
 0x2a6   : > { %1696 = vmatpush.msrb.mxu0 %v1569_v54  ;;  %1758 = vmatpush.msrb.mxu2 %v3225_v17  ;;  %v1826_v54 = vsub.f32 %v3256_v57, %v1825_v61 }
 0x2a7   : > { %1722 = vmatpush.msrb.mxu1 %v3037_v28  ;;  %1804 = vmatpush.msrb.mxu3 %v1803_v23  ;;  %v1815_v28 = vand.u32 4294901760, %v1814_v26  ;;  %v1821_v52 = vand.u32 4294901760, %v1820_v31 }
 0x2a8   : > { %1700 = vmatpush.msrb.mxu0 %v1575_v60  ;;  %1760 = vmatpush.msrb.mxu2 %v3223_v18  ;;  %v1832_v60 = vsub.f32 %v3274_v11, %v1831_v62 }
 0x2a9   : > { %1724 = vmatpush.msrb.mxu1 %v3007_v50  ;;  %1810 = vmatpush.msrb.mxu3 %v1809_v63  ;;  %v1827_v50 = vand.u32 4294901760, %v1826_v54 }
 0x2aa   : > { %1704 = vmatpush.msrb.mxu0 %v1581_v15  ;;  %1762 = vmatpush.msrb.mxu2 %v3228_v6 }
 0x2ab   : > { %1726 = vmatpush.msrb.mxu1 %v3081_v32  ;;  %1816 = vmatpush.msrb.mxu3 %v1815_v28  ;;  %v1833_v32 = vand.u32 4294901760, %v1832_v60 }
 0x2ac   : > { %1849 = vmatpush.msra.mxu0 %v3157_v51  ;;  %1764 = vmatpush.msrb.mxu2 %v3242_v48 }
 0x2ad   : > { %1728 = vmatpush.msrb.mxu1 %v3045_v10  ;;  %1822 = vmatpush.msrb.mxu3 %v1821_v52 }
 0x2ae   : > { %1852 = vmatpush.msra.mxu0 %v3170_v20  ;;  %1922 = vmatpush.msra.mxu2 %v1783_v9 }
 0x2af   : > { %1730 = vmatpush.msrb.mxu1 %v3118_v30  ;;  %1828 = vmatpush.msrb.mxu3 %v1827_v50 }
 0x2b0   : > { %1855 = vmatpush.msra.mxu0 %v3183_v27  ;;  %1926 = vmatpush.msra.mxu2 %v1789_v2 }
 0x2b1   : > { %1732 = vmatpush.msrb.mxu1 %v3167_v47  ;;  %1834 = vmatpush.msrb.mxu3 %v1833_v32 }
 0x2b2   : > { %1858 = vmatpush.msra.mxu0 %v3191_v49  ;;  %1930 = vmatpush.msra.mxu2 %v1795_v37 }
 0x2b3   : > { %1658 = vmatmul.f32.vlgmr.msra.gmra.mxu3 %v2947_v43  ;;  %1734 = vmatpush.msrb.mxu1 %v3123_v56 }
 0x2b4   : > { %1968 = vmatpush.msra.mxu3 %v3132_v22  ;;  %1586 = vmatmul.f32.vlgmr.msra.gmra.mxu1 %v2882_v33 }
 0x2b5   : > { %1861 = vmatpush.msra.mxu0 %v3201_v36  ;;  %1888 = vmatpush.msra.mxu1 %v3132_v22 }
 0x2b6   : > { %1934 = vmatpush.msra.mxu2 %v1801_v14  ;;  %1970 = vmatpush.msra.mxu3 %v3141_v34 }
 0x2b7   : > { %1864 = vmatpush.msra.mxu0 %v3238_v5  ;;  %1890 = vmatpush.msra.mxu1 %v3141_v34 }
 0x2b8   : > { %1938 = vmatpush.msra.mxu2 %v1807_v24  ;;  %1972 = vmatpush.msra.mxu3 %v3154_v45 }
 0x2b9   : > { %1867 = vmatpush.msra.mxu0 %v3245_v35  ;;  %1892 = vmatpush.msra.mxu1 %v3154_v45 }
 0x2ba   : > { %1942 = vmatpush.msra.mxu2 %v1813_v16  ;;  %1974 = vmatpush.msra.mxu3 %v3172_v41 }
 0x2bb   : > { %1770 = vmatmul.f32.vlgmr.msrb.gmra.mxu2 %v2991_v29  ;;  %1870 = vmatpush.msra.mxu0 %v3256_v57 }
 0x2bc   : > { %1894 = vmatpush.msra.mxu1 %v3172_v41  ;;  %1946 = vmatpush.msra.mxu2 %v1819_v13 }
 0x2bd   : > { %1706 = vmatmul.f32.vlgmr.msrb.gmra.mxu0 %v2882_v33  ;;  %1976 = vmatpush.msra.mxu3 %v3176_v55 }
 0x2be   : > { %1836 = vmatmul.f32.vlgmr.msrb.gmra.mxu3 %v2882_v33  ;;  %1873 = vmatpush.msra.mxu0 %v3274_v11 }
 0x2bf   : > { %1896 = vmatpush.msra.mxu1 %v3176_v55  ;;  %1950 = vmatpush.msra.mxu2 %v1825_v61 }
 0x2c0   : > { %1736 = vmatmul.f32.vlgmr.msrb.gmra.mxu1 %v2882_v33  ;;  %1978 = vmatpush.msra.mxu3 %v3225_v17 }
 0x2c1   : > { %1898 = vmatpush.msra.mxu1 %v3225_v17  ;;  %1954 = vmatpush.msra.mxu2 %v1831_v62 }
 0x2c2   : > { %1980 = vmatpush.msra.mxu3 %v3223_v18 }
 0x2c3   : > { %1900 = vmatpush.msra.mxu1 %v3223_v18  ;;  %1956 = vmatmul.f32.vlgmr.msra.gmra.mxu2 %v2882_v33 }
 0x2c4   : > { %1982 = vmatpush.msra.mxu3 %v3228_v6 }
 0x2c5   : > { %1902 = vmatpush.msra.mxu1 %v3228_v6  ;;  %1876 = vmatmul.f32.vlgmr.msra.gmra.mxu0 %v2923_v38 }
 0x2c6   : > { %1984 = vmatpush.msra.mxu3 %v3242_v48 }
 0x2c7   : > { %1904 = vmatpush.msra.mxu1 %v3242_v48  ;;  %1986 = vmatmul.f32.vlgmr.msra.gmra.mxu3 %v2882_v33 }
 0x2c8   : > { %1908 = vmatmul.f32.vlgmr.msra.gmra.mxu1 %v2947_v43 }
 0x2f0   : > { %v1235_v10 = vpop.permute.xlu0 %1234 }
 0x2f4   : > { %v1377_v34 = vpop.f32.mrf.mxu0 }
 0x2f7   : > { %v1409_v45 = vpop.f32.mrf.mxu1 }
 0x2fb   : > { %v1271_v29 = vpop.f32.mrf.mxu2 }
 0x2fc   : > { %v1272_v30 = vadd.f32 %v1271_v29, %v1235_v10 }
 0x2ff   : > { %v1337_v56 = vpop.f32.mrf.mxu3 }
 0x300   : > { %v1338_v22 = vadd.f32 %v1337_v56, %v1272_v30 }
 0x302   : > { %v1378_v42 = vadd.f32 %v1377_v34, %v1338_v22 }
 0x304   : > { %v1410_v51 = vadd.f32 %v1409_v45, %v1378_v42 }
 0x30d   : > { %v1457_v47 = vpop.f32.mrf.mxu2 }
 0x30e   : > { %v1458_v38 = vadd.f32 %v1457_v47, %v1410_v51 }
 0x313   : > { %v1487_v20 = vpop.f32.mrf.mxu3 }
 0x314   : > { %v1488_v41 = vadd.f32 %v1487_v20, %v1458_v38 }
 0x316   : > { %v1990_v33 = vmax.f32 %v1488_v41, 0.0  ;;  %v1521_v43 = vpop.f32.mrf.mxu0 }
 0x317   : > { %v1522_v15 = vadd.f32 %v1521_v43, %v1235_v10 }
 0x318   : > { %1993 = vst [vmem:[%s251_s27] sm:$0xff] %v1990_v33 }
 0x31e   : > { %v1627_v27 = vpop.f32.mrf.mxu2 }
 0x331   : > { %v1587_v55 = vpop.f32.mrf.mxu1 }
 0x332   : > { %v1588_v9 = vadd.f32 %v1587_v55, %v1522_v15 }
 0x334   : > { %v1628_v49 = vadd.f32 %v1627_v27, %v1588_v9 }
 0x336   : > { %v1659_v1 = vpop.f32.mrf.mxu3 }
 0x337   : > { %v1660_v2 = vadd.f32 %v1659_v1, %v1628_v49 }
 0x33a   : > { %v1707_v36 = vpop.f32.mrf.mxu0 }
 0x33b   : > { %v1708_v19 = vadd.f32 %v1707_v36, %v1660_v2 }
 0x33d   : > { %v1737_v58 = vpop.f32.mrf.mxu1 }
 0x33e   : > { %v1738_v21 = vadd.f32 %v1737_v58, %v1708_v19  ;;  %v1771_v25 = vpop.f32.mrf.mxu2 }
 0x33f   : > { %v1772_v59 = vadd.f32 %v1771_v25, %v1235_v10 }
 0x340   : > { %v1991_v40 = vmax.f32 %v1738_v21, 0.0 }
 0x341   : > { %v1837_v39 = vpop.f32.mrf.mxu3 }
 0x342   : > { %1994 = vst [vmem:[%s251_s27 + $0x8] sm:$0xff] %v1991_v40  ;;  %v1838_v37 = vadd.f32 %v1837_v39, %v1772_v59  ;;  %v1877_v18 = vpop.f32.mrf.mxu0 }
 0x344   : > { %v1878_v17 = vadd.f32 %v1877_v18, %v1838_v37 }
 0x345   : > { %v1909_v53 = vpop.f32.mrf.mxu1 }
 0x346   : > { %v1910_v6 = vadd.f32 %v1909_v53, %v1878_v17  ;;  %v1957_v7 = vpop.f32.mrf.mxu2 }
 0x348   : > { %v1958_v14 = vadd.f32 %v1957_v7, %v1910_v6 }
 0x34a   : > { %v1987_v5 = vpop.f32.mrf.mxu3 }
 0x34b   : > { %v1988_v4 = vadd.f32 %v1987_v5, %v1958_v14 }
 0x34d   : > { %v1992_v48 = vmax.f32 %v1988_v4, 0.0 }
 0x34f   : > { %1995 = vst [vmem:[%s251_s27 + $0x10] sm:$0xff] %v1992_v48 }
 0x350 PF: > { %s16_s21 = sadd.s32 1, %s2090_s21  }
 0x351   : > { %p13_p4 = scmp.ge.s32.totalorder %s16_s21, 4  }
 0x353   :  { %15 = sbr.rel (!%p13_p4) target bundleno = 1 (0x1), region = 74 }

</bundles_post_ra>
